<compile_context>
chip_gen: v5e
topology: v5e:2x2
jax: 0.10.0
libtpu: 0.0.40
codegen_flags: <defaults>
</compile_context>

<pallas_src>
import functools

import jax
import jax.numpy as jnp
import numpy as np
from jax.experimental import pallas as pl
from jax.experimental.pallas import tpu as pltpu

_SUBLANE_PAD = 16  # bf16 sublane tile; Np % 16 == 0 makes every in-kernel reshape a free view


def _graph_learner_kernel(v_ref, qb_ref, w1v_ref, w2_ref, b2_ref, adj_ref, ind_ref,
                          *, top_k: int, num_valid: int):
    """One grid step = one tile of `bt` batch elements.

    v_ref  : [bt, Np, Dv] bf16     qb_ref : [bt, 1, M] f32   (= q @ W1_q + b1, hoisted)
    w1v_ref: [Dv, M]      bf16     w2_ref : [M, M]     bf16   b2_ref: [1, M] f32
    adj_ref: [bt, Np, K]  f32      ind_ref: [bt, Np, K] i32
    Np is padded to a multiple of 16 in the wrapper, so all reshapes below are
    layout-preserving views (no VMEM relayout copies).
    """
    bt, n_pad, dv = v_ref.shape
    m = w2_ref.shape[1]

    # FCNet 1: relu([v | q] @ W1 + b1) == relu(v @ W1_v + (q @ W1_q + b1)).
    h = jnp.dot(v_ref[...].reshape(bt * n_pad, dv), w1v_ref[...],
                preferred_element_type=jnp.float32)                    # [bt*Np, M], f32 acc
    h = jnp.maximum(h.reshape(bt, n_pad, m) + qb_ref[...], 0.0)        # (bt,1,M) broadcast

    # FCNet 2: relu(h @ W2 + b2).
    h = jnp.dot(h.astype(jnp.bfloat16).reshape(bt * n_pad, m), w2_ref[...],
                preferred_element_type=jnp.float32)
    h = jnp.maximum(h + b2_ref[...], 0.0)                              # [bt*Np, M] f32

    # Adjacency logits h @ h^T per batch element, kept in f32 (tiny FLOPs; avoids bf16
    # rounding flipping near-tied top-K indices).
    h3 = h.reshape(bt, n_pad, m)
    logits = jax.lax.dot_general(
        h3, h3, dimension_numbers=(((2,), (2,)), ((0,), (0,))),
        preferred_element_type=jnp.float32)                            # [bt, Np, Np]

    # Iterative top-K (K small & static -> fully unrolled). Padded object columns are masked
    # to -inf so they can never be selected.
    col_iota = jax.lax.broadcasted_iota(jnp.int32, (1, 1, n_pad), 2)
    if num_valid == n_pad:
        work = logits
    else:
        work = jnp.where(col_iota < num_valid, logits, -jnp.inf)

    vals, inds = [], []
    for k in range(top_k):
        mval = jnp.max(work, axis=-1, keepdims=True)                   # [bt, Np, 1]
        idx = jnp.min(jnp.where(work == mval, col_iota, n_pad),
                      axis=-1, keepdims=True)                          # lowest-index tie-break
        vals.append(mval)
        inds.append(idx)
        if k + 1 < top_k:
            work = jnp.where(col_iota == idx, -jnp.inf, work)
    top_vals = jnp.concatenate(vals, axis=-1)                          # [bt, Np, K]
    top_inds = jnp.concatenate(inds, axis=-1).astype(jnp.int32)

    # Softmax over the K selected logits (exact division; the operand is tiny).
    e = jnp.exp(top_vals - jnp.max(top_vals, axis=-1, keepdims=True))
    adj_ref[...] = e / jnp.sum(e, axis=-1, keepdims=True)
    ind_ref[...] = top_inds


def _tpu_kind():
    try:
        return jax.devices()[0].device_kind.lower()
    except Exception:
        return ""


def _tile_vmem_bytes(bt, n_pad, dv, m, top_k):
    # Conservative per-step working-set estimate (assumes double-buffered weights).
    v_in = 2 * bt * n_pad * dv * 2                       # double-buffered bf16 v tile
    qb_in = 2 * bt * m * 4                               # double-buffered f32 qb tile
    weights = 2 * (dv * m * 2 + m * m * 2 + m * 4)       # W1_v, W2 (bf16), b2 (f32)
    h_tmp = 2 * bt * n_pad * m * 4                       # two live f32 h intermediates
    logits = 3 * bt * n_pad * n_pad * 4                  # logits + top-K working copies
    out = 2 * bt * n_pad * top_k * 8                     # double-buffered adj + ind tiles
    return v_in + qb_in + weights + h_tmp + logits + out


def _pick_config(B, n_pad, dv, m, top_k):
    """Per-generation batch-tile and scoped-VMEM-limit heuristic."""
    kind = _tpu_kind()
    if "v5" in kind:       # v5e: MXU-bound at small tiles; bigger tiles only add VMEM pressure
        target_rows, vmem_limit = 288, 32 * 1024 * 1024
    elif "v7" in kind:     # v7x: only 64 MiB VMEM/TC -> cap tile, leave compiler headroom
        target_rows, vmem_limit = 1024, 48 * 1024 * 1024
    elif "v6" in kind:     # v6e: amortize the ~0.35 us/step pipeline overhead with big tiles
        target_rows, vmem_limit = 1536, 96 * 1024 * 1024
    else:
        target_rows, vmem_limit = 1024, 64 * 1024 * 1024
    budget = int(0.7 * vmem_limit)
    target_bt = max(1, min(B, target_rows // max(n_pad, 1)))
    feasible = [d for d in range(1, B + 1)
                if B % d == 0 and d <= target_bt
                and _tile_vmem_bytes(d, n_pad, dv, m, top_k) <= budget]
    if not feasible:
        feasible = [1]
    if "v7" in kind:       # prefer an even grid so both v7x TensorCores get equal work
        even = [d for d in feasible if (B // d) % 2 == 0]
        if even:
            feasible = even
    return max(feasible), vmem_limit


def graph_learner_forward(v, q, params, top_K, *, b_tile=None):
    """v: [B, N, Dv] f32, q: [B, Dq] f32. params = effective (weight-normed) W/b.

    Returns (adjacent_matrix [B, N, top_K] f32, top_ind [B, N, top_K] i32).
    # TODO(synk): torch.topk returns int64 indices; int32 is used here (TPU-native width).
    """
    B, N, Dv = v.shape
    Dq = q.shape[-1]
    M = params["w2"].shape[-1]
    assert params["w1"].shape[0] == Dv + Dq, "w1 must stack [v; q] input rows"
    assert 0 < top_K <= N, "top_K must not exceed num_obj"

    # Pad num_obj up to the bf16 sublane tile so in-kernel reshapes are free views.
    Np = -(-N // _SUBLANE_PAD) * _SUBLANE_PAD

    # bf16 MXU operands (f32 accumulation in-kernel); halves weight/input DMA + VMEM.
    w1v = params["w1"][:Dv].astype(jnp.bfloat16)            # [Dv, M]
    w2 = params["w2"].astype(jnp.bfloat16)                  # [M, M]
    b2 = params["b2"].reshape(1, M).astype(jnp.float32)     # [1, M]
    v_bf = v.astype(jnp.bfloat16)
    if Np != N:
        v_bf = jnp.pad(v_bf, ((0, 0), (0, Np - N), (0, 0)))

    # Hoist the 1-row query projection to one XLA GEMM (near-zero MXU utilization in-kernel).
    qb = (q @ params["w1"][Dv:] + params["b1"]).astype(jnp.float32).reshape(B, 1, M)

    auto_bt, vmem_limit = _pick_config(B, Np, Dv, M, top_K)
    if b_tile is None:
        b_tile = auto_bt
    assert B % b_tile == 0

    kernel = functools.partial(_graph_learner_kernel, top_k=top_K, num_valid=N)

    def build(single_buffer_weights):
        # Grid-invariant weights: single-buffer if supported (default double-buffering wastes
        # VMEM on data whose index_map never changes).
        wkw = {}
        if single_buffer_weights and hasattr(pl, "Buffered"):
            wkw = dict(pipeline_mode=pl.Buffered(1))
        return pl.pallas_call(
            kernel,
            out_shape=(
                jax.ShapeDtypeStruct((B, Np, top_K), jnp.float32),
                jax.ShapeDtypeStruct((B, Np, top_K), jnp.int32),
            ),
            grid_spec=pltpu.PrefetchScalarGridSpec(
                num_scalar_prefetch=0,
                grid=(B // b_tile,),
                in_specs=[
                    pl.BlockSpec((b_tile, Np, Dv), lambda b: (b, 0, 0)),
                    pl.BlockSpec((b_tile, 1, M), lambda b: (b, 0, 0)),
                    pl.BlockSpec((Dv, M), lambda b: (0, 0), **wkw),
                    pl.BlockSpec((M, M), lambda b: (0, 0), **wkw),
                    pl.BlockSpec((1, M), lambda b: (0, 0), **wkw),
                ],
                out_specs=[
                    pl.BlockSpec((b_tile, Np, top_K), lambda b: (b, 0, 0)),
                    pl.BlockSpec((b_tile, Np, top_K), lambda b: (b, 0, 0)),
                ],
            ),
            compiler_params=pltpu.CompilerParams(
                dimension_semantics=("parallel",),   # batch-tile axis shards across TCs
                vmem_limit_bytes=vmem_limit,
            ),
        )

    args = (v_bf, qb, w1v, w2, b2)
    try:
        adj, ind = build(True)(*args)
    except Exception:
        # Fallback for JAX builds that reject single-buffered (pl.Buffered(1)) BlockSpecs.
        adj, ind = build(False)(*args)

    if Np != N:
        adj, ind = adj[:, :N], ind[:, :N]
    return adj, ind


def ref_forward(v, q, params, top_K):
    """Pure-JAX reference mirroring the PyTorch forward with the same matmul numerics as the
    kernel (bf16 weight GEMMs, f32 accumulation, f32 logits)."""
    B, N, Dv = v.shape
    bf = jnp.bfloat16
    qb = q @ params["w1"][Dv:] + params["b1"]                               # [B, M]
    h = jnp.einsum("bnd,dm->bnm", v.astype(bf), params["w1"][:Dv].astype(bf),
                   preferred_element_type=jnp.float32) + qb[:, None, :]
    h = jax.nn.relu(h)
    h = jnp.einsum("bnm,mo->bno", h.astype(bf), params["w2"].astype(bf),
                   preferred_element_type=jnp.float32) + params["b2"]
    h = jax.nn.relu(h)
    logits = jnp.einsum("bnd,bmd->bnm", h, h, preferred_element_type=jnp.float32)
    vals, inds = jax.lax.top_k(logits, top_K)
    return jax.nn.softmax(vals, axis=-1), inds


if __name__ == "__main__":
    # Small shapes consistent with the module (real model: N~36, Dv=2048, Dq=1024, M=1024).
    # N=12 deliberately exercises the pad-to-16 + masked-top-K path.
    B, N, Dv, Dq, M, TOP_K = 2, 12, 64, 32, 32, 4

    key = jax.random.PRNGKey(0)
    k_v, k_q, k_w1, k_b1, k_w2, k_b2 = jax.random.split(key, 6)

    v = jax.random.normal(k_v, (B, N, Dv), jnp.float32)
    q = jax.random.normal(k_q, (B, Dq), jnp.float32)
    # v_mask is accepted by the torch forward but never used -> not an input here.

    # weight_norm'd Linear collapses to an effective (W, b) at inference time.
    params = {
        "w1": jax.random.normal(k_w1, (Dv + Dq, M), jnp.float32) * 0.05,
        "b1": jax.random.normal(k_b1, (M,), jnp.float32) * 0.05,
        "w2": jax.random.normal(k_w2, (M, M), jnp.float32) * 0.05,
        "b2": jax.random.normal(k_b2, (M,), jnp.float32) * 0.05,
    }

    adj, ind = graph_learner_forward(v, q, params, TOP_K)
    adj = jax.block_until_ready(adj)
    ind = jax.block_until_ready(ind)

    adj_ref, ind_ref = ref_forward(v, q, params, TOP_K)
    # MXU accumulation-order differences only -> modest tolerance on the softmax'ed values.
    np.testing.assert_allclose(np.asarray(adj), np.asarray(adj_ref), rtol=5e-3, atol=5e-3)
    np.testing.assert_array_equal(np.asarray(ind), np.asarray(ind_ref))

    print("KERNEL_OK")
</pallas_src>

<mosaic_0001>
module attributes {stable_mosaic.version = 11 : i64} {
  func.func @_graph_learner_kernel(%arg0: i32, %arg1: memref<2x16x64xbf16, #tpu.memory_space<vmem>>, %arg2: memref<2x1x32xf32, #tpu.memory_space<vmem>>, %arg3: memref<64x32xbf16, #tpu.memory_space<vmem>>, %arg4: memref<32x32xbf16, #tpu.memory_space<vmem>>, %arg5: memref<1x32xf32, #tpu.memory_space<vmem>>, %arg6: memref<2x16x4xf32, #tpu.memory_space<vmem>>, %arg7: memref<2x16x4xi32, #tpu.memory_space<vmem>>) attributes {dimension_semantics = [#tpu.dimension_semantics<parallel>], iteration_bounds = array<i64: 1>, scalar_prefetch = 0 : i64, scratch_operands = 0 : i64, tpu.core_type = #tpu.core_type<tc>, window_params = [{transform_indices = @transform_0, window_bounds = array<i64: 2, 16, 64>}, {transform_indices = @transform_1, window_bounds = array<i64: 2, 1, 32>}, {pipeline_mode = #tpu.pipeline_mode<synchronous>, transform_indices = @transform_2, window_bounds = array<i64: 64, 32>}, {pipeline_mode = #tpu.pipeline_mode<synchronous>, transform_indices = @transform_3, window_bounds = array<i64: 32, 32>}, {pipeline_mode = #tpu.pipeline_mode<synchronous>, transform_indices = @transform_4, window_bounds = array<i64: 1, 32>}, {transform_indices = @transform_5, window_bounds = array<i64: 2, 16, 4>}, {transform_indices = @transform_6, window_bounds = array<i64: 2, 16, 4>}]} {
    %c0 = arith.constant 0 : index
    %c0_0 = arith.constant 0 : index
    %c0_1 = arith.constant 0 : index
    %0 = vector.load %arg1[%c0, %c0_0, %c0_1] : memref<2x16x64xbf16, #tpu.memory_space<vmem>>, vector<2x16x64xbf16>
    %1 = vector.shape_cast %0 : vector<2x16x64xbf16> to vector<32x64xbf16>
    %c0_2 = arith.constant 0 : index
    %c0_3 = arith.constant 0 : index
    %2 = vector.load %arg3[%c0_2, %c0_3] : memref<64x32xbf16, #tpu.memory_space<vmem>>, vector<64x32xbf16>
    %cst = arith.constant dense<0.000000e+00> : vector<32x32xf32>
    %3 = tpu.matmul %1, %2, %cst {dimension_numbers = #tpu.dot_dimension_numbers<[1], [0], [0], [1], [0, 0, 1, 1], [], []>} : vector<32x64xbf16>, vector<64x32xbf16>, vector<32x32xf32> -> vector<32x32xf32>
    %4 = vector.shape_cast %3 : vector<32x32xf32> to vector<2x16x32xf32>
    %c0_4 = arith.constant 0 : index
    %c0_5 = arith.constant 0 : index
    %c0_6 = arith.constant 0 : index
    %5 = vector.load %arg2[%c0_4, %c0_5, %c0_6] : memref<2x1x32xf32, #tpu.memory_space<vmem>>, vector<2x1x32xf32>
    %6 = vector.broadcast %5 : vector<2x1x32xf32> to vector<2x16x32xf32>
    %7 = arith.addf %4, %6 : vector<2x16x32xf32>
    %cst_7 = arith.constant 0.000000e+00 : f32
    %8 = vector.broadcast %cst_7 : f32 to vector<2x16x32xf32>
    %9 = arith.maximumf %7, %8 : vector<2x16x32xf32>
    %10 = arith.truncf %9 : vector<2x16x32xf32> to vector<2x16x32xbf16>
    %11 = vector.shape_cast %10 : vector<2x16x32xbf16> to vector<32x32xbf16>
    %c0_8 = arith.constant 0 : index
    %c0_9 = arith.constant 0 : index
    %12 = vector.load %arg4[%c0_8, %c0_9] : memref<32x32xbf16, #tpu.memory_space<vmem>>, vector<32x32xbf16>
    %cst_10 = arith.constant dense<0.000000e+00> : vector<32x32xf32>
    %13 = tpu.matmul %11, %12, %cst_10 {dimension_numbers = #tpu.dot_dimension_numbers<[1], [0], [0], [1], [0, 0, 1, 1], [], []>} : vector<32x32xbf16>, vector<32x32xbf16>, vector<32x32xf32> -> vector<32x32xf32>
    %c0_11 = arith.constant 0 : index
    %c0_12 = arith.constant 0 : index
    %14 = vector.load %arg5[%c0_11, %c0_12] : memref<1x32xf32, #tpu.memory_space<vmem>>, vector<1x32xf32>
    %15 = vector.broadcast %14 : vector<1x32xf32> to vector<32x32xf32>
    %16 = arith.addf %13, %15 : vector<32x32xf32>
    %cst_13 = arith.constant 0.000000e+00 : f32
    %17 = vector.broadcast %cst_13 : f32 to vector<32x32xf32>
    %18 = arith.maximumf %16, %17 : vector<32x32xf32>
    %19 = vector.shape_cast %18 : vector<32x32xf32> to vector<2x16x32xf32>
    %cst_14 = arith.constant dense<0.000000e+00> : vector<2x16x16xf32>
    %20 = tpu.matmul %19, %19, %cst_14 {dimension_numbers = #tpu.dot_dimension_numbers<[2], [2], [1], [1], [0, 0, 0, 1, 1, 1], [0], [0]>} : vector<2x16x32xf32>, vector<2x16x32xf32>, vector<2x16x16xf32> -> vector<2x16x16xf32>
    %21 = tpu.iota {dimensions = array<i32: 2>} : vector<1x1x16xi32>
    %c12_i32 = arith.constant 12 : i32
    %22 = vector.broadcast %c12_i32 : i32 to vector<1x1x16xi32>
    %23 = arith.cmpi slt, %21, %22 : vector<1x1x16xi32>
    %cst_15 = arith.constant 0xFF800000 : f32
    %24 = vector.shape_cast %23 : vector<1x1x16xi1> to vector<1x1x16xi1>
    %25 = vector.broadcast %24 : vector<1x1x16xi1> to vector<2x16x16xi1>
    %26 = vector.broadcast %cst_15 : f32 to vector<2x16x16xf32>
    %27 = arith.select %25, %20, %26 : vector<2x16x16xi1>, vector<2x16x16xf32>
    %cst_16 = arith.constant dense<0xFF800000> : vector<2x16xf32>
    %28 = vector.multi_reduction <maximumf>, %27, %cst_16 [2] : vector<2x16x16xf32> to vector<2x16xf32>
    %29 = vector.shape_cast %28 : vector<2x16xf32> to vector<2x16x1xf32>
    %30 = vector.broadcast %29 : vector<2x16x1xf32> to vector<2x16x16xf32>
    %31 = arith.cmpf oeq, %27, %30 : vector<2x16x16xf32>
    %c16_i32 = arith.constant 16 : i32
    %32 = vector.shape_cast %21 : vector<1x1x16xi32> to vector<1x1x16xi32>
    %33 = vector.broadcast %32 : vector<1x1x16xi32> to vector<2x16x16xi32>
    %34 = vector.broadcast %c16_i32 : i32 to vector<2x16x16xi32>
    %35 = arith.select %31, %33, %34 : vector<2x16x16xi1>, vector<2x16x16xi32>
    %cst_17 = arith.constant dense<2147483647> : vector<2x16xi32>
    %36 = vector.multi_reduction <minsi>, %35, %cst_17 [2] : vector<2x16x16xi32> to vector<2x16xi32>
    %37 = vector.shape_cast %36 : vector<2x16xi32> to vector<2x16x1xi32>
    %38 = vector.broadcast %21 : vector<1x1x16xi32> to vector<2x16x16xi32>
    %39 = vector.broadcast %37 : vector<2x16x1xi32> to vector<2x16x16xi32>
    %40 = arith.cmpi eq, %38, %39 : vector<2x16x16xi32>
    %cst_18 = arith.constant 0xFF800000 : f32
    %41 = vector.broadcast %cst_18 : f32 to vector<2x16x16xf32>
    %42 = arith.select %40, %41, %27 : vector<2x16x16xi1>, vector<2x16x16xf32>
    %cst_19 = arith.constant dense<0xFF800000> : vector<2x16xf32>
    %43 = vector.multi_reduction <maximumf>, %42, %cst_19 [2] : vector<2x16x16xf32> to vector<2x16xf32>
    %44 = vector.shape_cast %43 : vector<2x16xf32> to vector<2x16x1xf32>
    %45 = vector.broadcast %44 : vector<2x16x1xf32> to vector<2x16x16xf32>
    %46 = arith.cmpf oeq, %42, %45 : vector<2x16x16xf32>
    %c16_i32_20 = arith.constant 16 : i32
    %47 = vector.shape_cast %21 : vector<1x1x16xi32> to vector<1x1x16xi32>
    %48 = vector.broadcast %47 : vector<1x1x16xi32> to vector<2x16x16xi32>
    %49 = vector.broadcast %c16_i32_20 : i32 to vector<2x16x16xi32>
    %50 = arith.select %46, %48, %49 : vector<2x16x16xi1>, vector<2x16x16xi32>
    %cst_21 = arith.constant dense<2147483647> : vector<2x16xi32>
    %51 = vector.multi_reduction <minsi>, %50, %cst_21 [2] : vector<2x16x16xi32> to vector<2x16xi32>
    %52 = vector.shape_cast %51 : vector<2x16xi32> to vector<2x16x1xi32>
    %53 = vector.broadcast %21 : vector<1x1x16xi32> to vector<2x16x16xi32>
    %54 = vector.broadcast %52 : vector<2x16x1xi32> to vector<2x16x16xi32>
    %55 = arith.cmpi eq, %53, %54 : vector<2x16x16xi32>
    %cst_22 = arith.constant 0xFF800000 : f32
    %56 = vector.broadcast %cst_22 : f32 to vector<2x16x16xf32>
    %57 = arith.select %55, %56, %42 : vector<2x16x16xi1>, vector<2x16x16xf32>
    %cst_23 = arith.constant dense<0xFF800000> : vector<2x16xf32>
    %58 = vector.multi_reduction <maximumf>, %57, %cst_23 [2] : vector<2x16x16xf32> to vector<2x16xf32>
    %59 = vector.shape_cast %58 : vector<2x16xf32> to vector<2x16x1xf32>
    %60 = vector.broadcast %59 : vector<2x16x1xf32> to vector<2x16x16xf32>
    %61 = arith.cmpf oeq, %57, %60 : vector<2x16x16xf32>
    %c16_i32_24 = arith.constant 16 : i32
    %62 = vector.shape_cast %21 : vector<1x1x16xi32> to vector<1x1x16xi32>
    %63 = vector.broadcast %62 : vector<1x1x16xi32> to vector<2x16x16xi32>
    %64 = vector.broadcast %c16_i32_24 : i32 to vector<2x16x16xi32>
    %65 = arith.select %61, %63, %64 : vector<2x16x16xi1>, vector<2x16x16xi32>
    %cst_25 = arith.constant dense<2147483647> : vector<2x16xi32>
    %66 = vector.multi_reduction <minsi>, %65, %cst_25 [2] : vector<2x16x16xi32> to vector<2x16xi32>
    %67 = vector.shape_cast %66 : vector<2x16xi32> to vector<2x16x1xi32>
    %68 = vector.broadcast %21 : vector<1x1x16xi32> to vector<2x16x16xi32>
    %69 = vector.broadcast %67 : vector<2x16x1xi32> to vector<2x16x16xi32>
    %70 = arith.cmpi eq, %68, %69 : vector<2x16x16xi32>
    %cst_26 = arith.constant 0xFF800000 : f32
    %71 = vector.broadcast %cst_26 : f32 to vector<2x16x16xf32>
    %72 = arith.select %70, %71, %57 : vector<2x16x16xi1>, vector<2x16x16xf32>
    %cst_27 = arith.constant dense<0xFF800000> : vector<2x16xf32>
    %73 = vector.multi_reduction <maximumf>, %72, %cst_27 [2] : vector<2x16x16xf32> to vector<2x16xf32>
    %74 = vector.shape_cast %73 : vector<2x16xf32> to vector<2x16x1xf32>
    %75 = vector.broadcast %74 : vector<2x16x1xf32> to vector<2x16x16xf32>
    %76 = arith.cmpf oeq, %72, %75 : vector<2x16x16xf32>
    %c16_i32_28 = arith.constant 16 : i32
    %77 = vector.shape_cast %21 : vector<1x1x16xi32> to vector<1x1x16xi32>
    %78 = vector.broadcast %77 : vector<1x1x16xi32> to vector<2x16x16xi32>
    %79 = vector.broadcast %c16_i32_28 : i32 to vector<2x16x16xi32>
    %80 = arith.select %76, %78, %79 : vector<2x16x16xi1>, vector<2x16x16xi32>
    %cst_29 = arith.constant dense<2147483647> : vector<2x16xi32>
    %81 = vector.multi_reduction <minsi>, %80, %cst_29 [2] : vector<2x16x16xi32> to vector<2x16xi32>
    %82 = vector.shape_cast %81 : vector<2x16xi32> to vector<2x16x1xi32>
    %83 = tpu.concatenate %29, %44, %59, %74 in 2 : vector<2x16x1xf32>, vector<2x16x1xf32>, vector<2x16x1xf32>, vector<2x16x1xf32> -> vector<2x16x4xf32>
    %84 = tpu.concatenate %37, %52, %67, %82 in 2 : vector<2x16x1xi32>, vector<2x16x1xi32>, vector<2x16x1xi32>, vector<2x16x1xi32> -> vector<2x16x4xi32>
    %cst_30 = arith.constant dense<0xFF800000> : vector<2x16xf32>
    %85 = vector.multi_reduction <maximumf>, %83, %cst_30 [2] : vector<2x16x4xf32> to vector<2x16xf32>
    %86 = vector.shape_cast %85 : vector<2x16xf32> to vector<2x16x1xf32>
    %87 = vector.broadcast %86 : vector<2x16x1xf32> to vector<2x16x4xf32>
    %88 = arith.subf %83, %87 : vector<2x16x4xf32>
    %89 = math.exp %88 : vector<2x16x4xf32>
    %cst_31 = arith.constant dense<0.000000e+00> : vector<2x16xf32>
    %90 = vector.multi_reduction <add>, %89, %cst_31 [2] : vector<2x16x4xf32> to vector<2x16xf32>
    %91 = vector.shape_cast %90 : vector<2x16xf32> to vector<2x16x1xf32>
    %92 = vector.broadcast %91 : vector<2x16x1xf32> to vector<2x16x4xf32>
    %93 = arith.divf %89, %92 : vector<2x16x4xf32>
    %c0_32 = arith.constant 0 : index
    %c0_33 = arith.constant 0 : index
    %c0_34 = arith.constant 0 : index
    %94 = vector.load %arg6[%c0_32, %c0_33, %c0_34] : memref<2x16x4xf32, #tpu.memory_space<vmem>>, vector<2x16x4xf32>
    tpu.vector_store %arg6[%c0_32, %c0_33, %c0_34], %93 {strides = array<i32>} : memref<2x16x4xf32, #tpu.memory_space<vmem>>, vector<2x16x4xf32>,
    %c0_35 = arith.constant 0 : index
    %c0_36 = arith.constant 0 : index
    %c0_37 = arith.constant 0 : index
    %95 = vector.load %arg7[%c0_35, %c0_36, %c0_37] : memref<2x16x4xi32, #tpu.memory_space<vmem>>, vector<2x16x4xi32>
    tpu.vector_store %arg7[%c0_35, %c0_36, %c0_37], %84 {strides = array<i32>} : memref<2x16x4xi32, #tpu.memory_space<vmem>>, vector<2x16x4xi32>,
    return
  }
  func.func @transform_0(%arg0: i32) -> (i32, i32, i32) {
    %c0_i32 = arith.constant 0 : i32
    %c0_i32_0 = arith.constant 0 : i32
    %c0_i32_1 = arith.constant 0 : i32
    return %arg0, %c0_i32, %c0_i32_0 : i32, i32, i32
  }
  func.func @transform_1(%arg0: i32) -> (i32, i32, i32) {
    %c0_i32 = arith.constant 0 : i32
    %c0_i32_0 = arith.constant 0 : i32
    %c0_i32_1 = arith.constant 0 : i32
    return %arg0, %c0_i32, %c0_i32_0 : i32, i32, i32
  }
  func.func @transform_2(%arg0: i32) -> (i32, i32) {
    %c0_i32 = arith.constant 0 : i32
    %c0_i32_0 = arith.constant 0 : i32
    %c0_i32_1 = arith.constant 0 : i32
    return %c0_i32, %c0_i32_0 : i32, i32
  }
  func.func @transform_3(%arg0: i32) -> (i32, i32) {
    %c0_i32 = arith.constant 0 : i32
    %c0_i32_0 = arith.constant 0 : i32
    %c0_i32_1 = arith.constant 0 : i32
    return %c0_i32, %c0_i32_0 : i32, i32
  }
  func.func @transform_4(%arg0: i32) -> (i32, i32) {
    %c0_i32 = arith.constant 0 : i32
    %c0_i32_0 = arith.constant 0 : i32
    %c0_i32_1 = arith.constant 0 : i32
    return %c0_i32, %c0_i32_0 : i32, i32
  }
  func.func @transform_5(%arg0: i32) -> (i32, i32, i32) {
    %c0_i32 = arith.constant 0 : i32
    %c0_i32_0 = arith.constant 0 : i32
    %c0_i32_1 = arith.constant 0 : i32
    return %arg0, %c0_i32, %c0_i32_0 : i32, i32, i32
  }
  func.func @transform_6(%arg0: i32) -> (i32, i32, i32) {
    %c0_i32 = arith.constant 0 : i32
    %c0_i32_0 = arith.constant 0 : i32
    %c0_i32_1 = arith.constant 0 : i32
    return %arg0, %c0_i32, %c0_i32_0 : i32, i32, i32
  }
}

module attributes {stable_mosaic.version = 11 : i64} {
  func.func @_graph_learner_kernel(%arg0: i32, %arg1: memref<2x16x64xbf16, #tpu.memory_space<vmem>>, %arg2: memref<2x1x32xf32, #tpu.memory_space<vmem>>, %arg3: memref<64x32xbf16, #tpu.memory_space<vmem>>, %arg4: memref<32x32xbf16, #tpu.memory_space<vmem>>, %arg5: memref<1x32xf32, #tpu.memory_space<vmem>>, %arg6: memref<2x16x4xf32, #tpu.memory_space<vmem>>, %arg7: memref<2x16x4xi32, #tpu.memory_space<vmem>>) attributes {dimension_semantics = [#tpu.dimension_semantics<parallel>], iteration_bounds = array<i64: 1>, scalar_prefetch = 0 : i64, scratch_operands = 0 : i64, tpu.core_type = #tpu.core_type<tc>, window_params = [{transform_indices = @transform_0, window_bounds = array<i64: 2, 16, 64>}, {transform_indices = @transform_1, window_bounds = array<i64: 2, 1, 32>}, {pipeline_mode = #tpu.pipeline_mode<synchronous>, transform_indices = @transform_2, window_bounds = array<i64: 64, 32>}, {pipeline_mode = #tpu.pipeline_mode<synchronous>, transform_indices = @transform_3, window_bounds = array<i64: 32, 32>}, {pipeline_mode = #tpu.pipeline_mode<synchronous>, transform_indices = @transform_4, window_bounds = array<i64: 1, 32>}, {transform_indices = @transform_5, window_bounds = array<i64: 2, 16, 4>}, {transform_indices = @transform_6, window_bounds = array<i64: 2, 16, 4>}]} {
    %c0 = arith.constant 0 : index
    %c0_0 = arith.constant 0 : index
    %c0_1 = arith.constant 0 : index
    %0 = vector.load %arg1[%c0, %c0_0, %c0_1] : memref<2x16x64xbf16, #tpu.memory_space<vmem>>, vector<2x16x64xbf16>
    %1 = vector.shape_cast %0 : vector<2x16x64xbf16> to vector<32x64xbf16>
    %c0_2 = arith.constant 0 : index
    %c0_3 = arith.constant 0 : index
    %2 = vector.load %arg3[%c0_2, %c0_3] : memref<64x32xbf16, #tpu.memory_space<vmem>>, vector<64x32xbf16>
    %cst = arith.constant dense<0.000000e+00> : vector<32x32xf32>
    %3 = tpu.matmul %1, %2, %cst {dimension_numbers = #tpu.dot_dimension_numbers<[1], [0], [0], [1], [0, 0, 1, 1], [], []>} : vector<32x64xbf16>, vector<64x32xbf16>, vector<32x32xf32> -> vector<32x32xf32>
    %4 = vector.shape_cast %3 : vector<32x32xf32> to vector<2x16x32xf32>
    %c0_4 = arith.constant 0 : index
    %c0_5 = arith.constant 0 : index
    %c0_6 = arith.constant 0 : index
    %5 = vector.load %arg2[%c0_4, %c0_5, %c0_6] : memref<2x1x32xf32, #tpu.memory_space<vmem>>, vector<2x1x32xf32>
    %6 = vector.broadcast %5 : vector<2x1x32xf32> to vector<2x16x32xf32>
    %7 = arith.addf %4, %6 : vector<2x16x32xf32>
    %cst_7 = arith.constant 0.000000e+00 : f32
    %8 = vector.broadcast %cst_7 : f32 to vector<2x16x32xf32>
    %9 = arith.maximumf %7, %8 : vector<2x16x32xf32>
    %10 = arith.truncf %9 : vector<2x16x32xf32> to vector<2x16x32xbf16>
    %11 = vector.shape_cast %10 : vector<2x16x32xbf16> to vector<32x32xbf16>
    %c0_8 = arith.constant 0 : index
    %c0_9 = arith.constant 0 : index
    %12 = vector.load %arg4[%c0_8, %c0_9] : memref<32x32xbf16, #tpu.memory_space<vmem>>, vector<32x32xbf16>
    %cst_10 = arith.constant dense<0.000000e+00> : vector<32x32xf32>
    %13 = tpu.matmul %11, %12, %cst_10 {dimension_numbers = #tpu.dot_dimension_numbers<[1], [0], [0], [1], [0, 0, 1, 1], [], []>} : vector<32x32xbf16>, vector<32x32xbf16>, vector<32x32xf32> -> vector<32x32xf32>
    %c0_11 = arith.constant 0 : index
    %c0_12 = arith.constant 0 : index
    %14 = vector.load %arg5[%c0_11, %c0_12] : memref<1x32xf32, #tpu.memory_space<vmem>>, vector<1x32xf32>
    %15 = vector.broadcast %14 : vector<1x32xf32> to vector<32x32xf32>
    %16 = arith.addf %13, %15 : vector<32x32xf32>
    %cst_13 = arith.constant 0.000000e+00 : f32
    %17 = vector.broadcast %cst_13 : f32 to vector<32x32xf32>
    %18 = arith.maximumf %16, %17 : vector<32x32xf32>
    %19 = vector.shape_cast %18 : vector<32x32xf32> to vector<2x16x32xf32>
    %cst_14 = arith.constant dense<0.000000e+00> : vector<2x16x16xf32>
    %20 = tpu.matmul %19, %19, %cst_14 {dimension_numbers = #tpu.dot_dimension_numbers<[2], [2], [1], [1], [0, 0, 0, 1, 1, 1], [0], [0]>} : vector<2x16x32xf32>, vector<2x16x32xf32>, vector<2x16x16xf32> -> vector<2x16x16xf32>
    %21 = tpu.iota {dimensions = array<i32: 2>} : vector<1x1x16xi32>
    %c12_i32 = arith.constant 12 : i32
    %22 = vector.broadcast %c12_i32 : i32 to vector<1x1x16xi32>
    %23 = arith.cmpi slt, %21, %22 : vector<1x1x16xi32>
    %cst_15 = arith.constant 0xFF800000 : f32
    %24 = vector.shape_cast %23 : vector<1x1x16xi1> to vector<1x1x16xi1>
    %25 = vector.broadcast %24 : vector<1x1x16xi1> to vector<2x16x16xi1>
    %26 = vector.broadcast %cst_15 : f32 to vector<2x16x16xf32>
    %27 = arith.select %25, %20, %26 : vector<2x16x16xi1>, vector<2x16x16xf32>
    %cst_16 = arith.constant dense<0xFF800000> : vector<2x16xf32>
    %28 = vector.multi_reduction <maximumf>, %27, %cst_16 [2] : vector<2x16x16xf32> to vector<2x16xf32>
    %29 = vector.shape_cast %28 : vector<2x16xf32> to vector<2x16x1xf32>
    %30 = vector.broadcast %29 : vector<2x16x1xf32> to vector<2x16x16xf32>
    %31 = arith.cmpf oeq, %27, %30 : vector<2x16x16xf32>
    %c16_i32 = arith.constant 16 : i32
    %32 = vector.shape_cast %21 : vector<1x1x16xi32> to vector<1x1x16xi32>
    %33 = vector.broadcast %32 : vector<1x1x16xi32> to vector<2x16x16xi32>
    %34 = vector.broadcast %c16_i32 : i32 to vector<2x16x16xi32>
    %35 = arith.select %31, %33, %34 : vector<2x16x16xi1>, vector<2x16x16xi32>
    %cst_17 = arith.constant dense<2147483647> : vector<2x16xi32>
    %36 = vector.multi_reduction <minsi>, %35, %cst_17 [2] : vector<2x16x16xi32> to vector<2x16xi32>
    %37 = vector.shape_cast %36 : vector<2x16xi32> to vector<2x16x1xi32>
    %38 = vector.broadcast %21 : vector<1x1x16xi32> to vector<2x16x16xi32>
    %39 = vector.broadcast %37 : vector<2x16x1xi32> to vector<2x16x16xi32>
    %40 = arith.cmpi eq, %38, %39 : vector<2x16x16xi32>
    %cst_18 = arith.constant 0xFF800000 : f32
    %41 = vector.broadcast %cst_18 : f32 to vector<2x16x16xf32>
    %42 = arith.select %40, %41, %27 : vector<2x16x16xi1>, vector<2x16x16xf32>
    %cst_19 = arith.constant dense<0xFF800000> : vector<2x16xf32>
    %43 = vector.multi_reduction <maximumf>, %42, %cst_19 [2] : vector<2x16x16xf32> to vector<2x16xf32>
    %44 = vector.shape_cast %43 : vector<2x16xf32> to vector<2x16x1xf32>
    %45 = vector.broadcast %44 : vector<2x16x1xf32> to vector<2x16x16xf32>
    %46 = arith.cmpf oeq, %42, %45 : vector<2x16x16xf32>
    %c16_i32_20 = arith.constant 16 : i32
    %47 = vector.shape_cast %21 : vector<1x1x16xi32> to vector<1x1x16xi32>
    %48 = vector.broadcast %47 : vector<1x1x16xi32> to vector<2x16x16xi32>
    %49 = vector.broadcast %c16_i32_20 : i32 to vector<2x16x16xi32>
    %50 = arith.select %46, %48, %49 : vector<2x16x16xi1>, vector<2x16x16xi32>
    %cst_21 = arith.constant dense<2147483647> : vector<2x16xi32>
    %51 = vector.multi_reduction <minsi>, %50, %cst_21 [2] : vector<2x16x16xi32> to vector<2x16xi32>
    %52 = vector.shape_cast %51 : vector<2x16xi32> to vector<2x16x1xi32>
    %53 = vector.broadcast %21 : vector<1x1x16xi32> to vector<2x16x16xi32>
    %54 = vector.broadcast %52 : vector<2x16x1xi32> to vector<2x16x16xi32>
    %55 = arith.cmpi eq, %53, %54 : vector<2x16x16xi32>
    %cst_22 = arith.constant 0xFF800000 : f32
    %56 = vector.broadcast %cst_22 : f32 to vector<2x16x16xf32>
    %57 = arith.select %55, %56, %42 : vector<2x16x16xi1>, vector<2x16x16xf32>
    %cst_23 = arith.constant dense<0xFF800000> : vector<2x16xf32>
    %58 = vector.multi_reduction <maximumf>, %57, %cst_23 [2] : vector<2x16x16xf32> to vector<2x16xf32>
    %59 = vector.shape_cast %58 : vector<2x16xf32> to vector<2x16x1xf32>
    %60 = vector.broadcast %59 : vector<2x16x1xf32> to vector<2x16x16xf32>
    %61 = arith.cmpf oeq, %57, %60 : vector<2x16x16xf32>
    %c16_i32_24 = arith.constant 16 : i32
    %62 = vector.shape_cast %21 : vector<1x1x16xi32> to vector<1x1x16xi32>
    %63 = vector.broadcast %62 : vector<1x1x16xi32> to vector<2x16x16xi32>
    %64 = vector.broadcast %c16_i32_24 : i32 to vector<2x16x16xi32>
    %65 = arith.select %61, %63, %64 : vector<2x16x16xi1>, vector<2x16x16xi32>
    %cst_25 = arith.constant dense<2147483647> : vector<2x16xi32>
    %66 = vector.multi_reduction <minsi>, %65, %cst_25 [2] : vector<2x16x16xi32> to vector<2x16xi32>
    %67 = vector.shape_cast %66 : vector<2x16xi32> to vector<2x16x1xi32>
    %68 = vector.broadcast %21 : vector<1x1x16xi32> to vector<2x16x16xi32>
    %69 = vector.broadcast %67 : vector<2x16x1xi32> to vector<2x16x16xi32>
    %70 = arith.cmpi eq, %68, %69 : vector<2x16x16xi32>
    %cst_26 = arith.constant 0xFF800000 : f32
    %71 = vector.broadcast %cst_26 : f32 to vector<2x16x16xf32>
    %72 = arith.select %70, %71, %57 : vector<2x16x16xi1>, vector<2x16x16xf32>
    %cst_27 = arith.constant dense<0xFF800000> : vector<2x16xf32>
    %73 = vector.multi_reduction <maximumf>, %72, %cst_27 [2] : vector<2x16x16xf32> to vector<2x16xf32>
    %74 = vector.shape_cast %73 : vector<2x16xf32> to vector<2x16x1xf32>
    %75 = vector.broadcast %74 : vector<2x16x1xf32> to vector<2x16x16xf32>
    %76 = arith.cmpf oeq, %72, %75 : vector<2x16x16xf32>
    %c16_i32_28 = arith.constant 16 : i32
    %77 = vector.shape_cast %21 : vector<1x1x16xi32> to vector<1x1x16xi32>
    %78 = vector.broadcast %77 : vector<1x1x16xi32> to vector<2x16x16xi32>
    %79 = vector.broadcast %c16_i32_28 : i32 to vector<2x16x16xi32>
    %80 = arith.select %76, %78, %79 : vector<2x16x16xi1>, vector<2x16x16xi32>
    %cst_29 = arith.constant dense<2147483647> : vector<2x16xi32>
    %81 = vector.multi_reduction <minsi>, %80, %cst_29 [2] : vector<2x16x16xi32> to vector<2x16xi32>
    %82 = vector.shape_cast %81 : vector<2x16xi32> to vector<2x16x1xi32>
    %83 = tpu.concatenate %29, %44, %59, %74 in 2 : vector<2x16x1xf32>, vector<2x16x1xf32>, vector<2x16x1xf32>, vector<2x16x1xf32> -> vector<2x16x4xf32>
    %84 = tpu.concatenate %37, %52, %67, %82 in 2 : vector<2x16x1xi32>, vector<2x16x1xi32>, vector<2x16x1xi32>, vector<2x16x1xi32> -> vector<2x16x4xi32>
    %cst_30 = arith.constant dense<0xFF800000> : vector<2x16xf32>
    %85 = vector.multi_reduction <maximumf>, %83, %cst_30 [2] : vector<2x16x4xf32> to vector<2x16xf32>
    %86 = vector.shape_cast %85 : vector<2x16xf32> to vector<2x16x1xf32>
    %87 = vector.broadcast %86 : vector<2x16x1xf32> to vector<2x16x4xf32>
    %88 = arith.subf %83, %87 : vector<2x16x4xf32>
    %89 = math.exp %88 : vector<2x16x4xf32>
    %cst_31 = arith.constant dense<0.000000e+00> : vector<2x16xf32>
    %90 = vector.multi_reduction <add>, %89, %cst_31 [2] : vector<2x16x4xf32> to vector<2x16xf32>
    %91 = vector.shape_cast %90 : vector<2x16xf32> to vector<2x16x1xf32>
    %92 = vector.broadcast %91 : vector<2x16x1xf32> to vector<2x16x4xf32>
    %93 = arith.divf %89, %92 : vector<2x16x4xf32>
    %c0_32 = arith.constant 0 : index
    %c0_33 = arith.constant 0 : index
    %c0_34 = arith.constant 0 : index
    %94 = vector.load %arg6[%c0_32, %c0_33, %c0_34] : memref<2x16x4xf32, #tpu.memory_space<vmem>>, vector<2x16x4xf32>
    tpu.vector_store %arg6[%c0_32, %c0_33, %c0_34], %93 {strides = array<i32>} : memref<2x16x4xf32, #tpu.memory_space<vmem>>, vector<2x16x4xf32>,
    %c0_35 = arith.constant 0 : index
    %c0_36 = arith.constant 0 : index
    %c0_37 = arith.constant 0 : index
    %95 = vector.load %arg7[%c0_35, %c0_36, %c0_37] : memref<2x16x4xi32, #tpu.memory_space<vmem>>, vector<2x16x4xi32>
    tpu.vector_store %arg7[%c0_35, %c0_36, %c0_37], %84 {strides = array<i32>} : memref<2x16x4xi32, #tpu.memory_space<vmem>>, vector<2x16x4xi32>,
    return
  }
  func.func @transform_0(%arg0: i32) -> (i32, i32, i32) {
    %c0_i32 = arith.constant 0 : i32
    %c0_i32_0 = arith.constant 0 : i32
    %c0_i32_1 = arith.constant 0 : i32
    return %arg0, %c0_i32, %c0_i32_0 : i32, i32, i32
  }
  func.func @transform_1(%arg0: i32) -> (i32, i32, i32) {
    %c0_i32 = arith.constant 0 : i32
    %c0_i32_0 = arith.constant 0 : i32
    %c0_i32_1 = arith.constant 0 : i32
    return %arg0, %c0_i32, %c0_i32_0 : i32, i32, i32
  }
  func.func @transform_2(%arg0: i32) -> (i32, i32) {
    %c0_i32 = arith.constant 0 : i32
    %c0_i32_0 = arith.constant 0 : i32
    %c0_i32_1 = arith.constant 0 : i32
    return %c0_i32, %c0_i32_0 : i32, i32
  }
  func.func @transform_3(%arg0: i32) -> (i32, i32) {
    %c0_i32 = arith.constant 0 : i32
    %c0_i32_0 = arith.constant 0 : i32
    %c0_i32_1 = arith.constant 0 : i32
    return %c0_i32, %c0_i32_0 : i32, i32
  }
  func.func @transform_4(%arg0: i32) -> (i32, i32) {
    %c0_i32 = arith.constant 0 : i32
    %c0_i32_0 = arith.constant 0 : i32
    %c0_i32_1 = arith.constant 0 : i32
    return %c0_i32, %c0_i32_0 : i32, i32
  }
  func.func @transform_5(%arg0: i32) -> (i32, i32, i32) {
    %c0_i32 = arith.constant 0 : i32
    %c0_i32_0 = arith.constant 0 : i32
    %c0_i32_1 = arith.constant 0 : i32
    return %arg0, %c0_i32, %c0_i32_0 : i32, i32, i32
  }
  func.func @transform_6(%arg0: i32) -> (i32, i32, i32) {
    %c0_i32 = arith.constant 0 : i32
    %c0_i32_0 = arith.constant 0 : i32
    %c0_i32_1 = arith.constant 0 : i32
    return %arg0, %c0_i32, %c0_i32_0 : i32, i32, i32
  }
}

</mosaic_0001>

<bundles_post_ra>
// kernel: tpu_custom_call.1
= control target key start
LH: loop header
LB: loop body
LE: loop exit
PB: predicated region body
PF: predicated region fallthrough
CT: control target
= control target key end

     0   :  { %vm69_vm0 = vcmask 523264   ;;  %vm145_vm1 = vcmask 261120   ;;  %v233_v45 = vlaneseq  ;;  %vm242_vm3 = vcmask 130048   ;;  %s1182_s2 = inlined_call_operand.vmem [shape: bf16[64,32], index: 2, kind: input, shape index: {}]   ;;  %s1183_s1 = inlined_call_operand.vmem [shape: f32[2,1,32], index: 1, kind: input, shape index: {}]   ;;  %s1184_s0 = inlined_call_operand.vmem [shape: bf16[2,16,64], index: 0, kind: input, shape index: {}]   ;;  %s1185_s4 = inlined_call_operand.vmem [shape: f32[1,32], index: 4, kind: input, shape index: {}]   ;;  %s1186_s3 = inlined_call_operand.vmem [shape: bf16[32,32], index: 3, kind: input, shape index: {}]   ;;  %s1187_s5 = inlined_call_operand.vmem [shape: f32[2,16,4], index: 5, kind: output, shape index: {0}]   ;;  %s1188_s6 = inlined_call_operand.vmem [shape: s32[2,16,4], index: 6, kind: output, shape index: {1}]  }
   0x1   :  { %v776_v0 = vld [vmem:[%s1182_s2 + $0x18] sm:$0xff]  ;;  %v775_v1 = vld [vmem:[%s1182_s2 + $0x10] sm:$0xff]  ;;  %v774_v2 = vld [vmem:[%s1182_s2 + $0x8] sm:$0xff] }
   0x2   :  { %80 = vmatpush.bf16.msra.mxu0 %v776_v0  ;;  %v773_v3 = vld [vmem:[%s1182_s2] sm:$0xff]  ;;  %v772_v5 = vld [vmem:[%s1184_s0 + $0x8] sm:$0xff]  ;;  %v876_v46 = vand.u32 127, %v233_v45 }
   0x3   :  { %v771_v4 = vld [vmem:[%s1184_s0] sm:$0xff]  ;;  %v778_v6 = vld [vmem:[%s1186_s3 + $0x8] sm:$0xff] }
   0x4   :  { %158 = vmatpush.bf16.msra.mxu1 %v778_v6  ;;  %v777_v7 = vld [vmem:[%s1186_s3] sm:$0xff]  ;;  %vm235_vm2 = vcmp.lt.s32.totalorder %v876_v46, 12 }
   0x5   :  { %v779_v8 = vld [vmem:[%s1183_s1] ss:$0 sm:$0xff]  ;;  %v780_v19 = vld [vmem:[%s1183_s1 + $0x1] ss:$0 sm:$0xff] }
   0x6   :  { %81 = vmatpush.bf16.msra.mxu0 %v775_v1  ;;  %v781_v33 = vld [vmem:[%s1185_s4] ss:$0 sm:$0xff] }
   0x8   :  { %159 = vmatpush.bf16.msra.mxu1 %v777_v7 }
   0xa   :  { %82 = vmatpush.bf16.msra.mxu0 %v774_v2 }
   0xe   :  { %83 = vmatpush.bf16.msra.mxu0 %v773_v3 }
  0x11   :  { %751 = vmatmul.msk.bf16.vlgmr.msra.gmra.mxu0 %vm69_vm0, %v771_v4 }
  0x21   :  { %752 = vmatmul.msk.bf16.gmra.mxu0 %vm69_vm0, %v772_v5 }
  0x8e   :  { %v85_v9 = vpop.f32.mrf.mxu0 }
  0x8f   :  { %v103_v10 = vadd.f32 %v779_v8, %v85_v9 }
  0x91   :  { %v107_v11 = vmax.f32 %v103_v10, 0.0 }
  0x93   :  { %v111_v14 = vpack.c.bf16 %v107_v11, %v107_v11 }
  0x95   :  { %v127_v17 = vunpack.c.l.b16 %v111_v14 }
  0x96   :  { %v87_v12 = vpop.f32.mrf.mxu0 }
  0x97   :  { %v104_v13 = vadd.f32 %v779_v8, %v87_v12 }
  0x99   :  { %v108_v15 = vmax.f32 %v104_v13, 0.0 }
  0x9b   :  { %v112_v16 = vpack.c.bf16 %v108_v15, %v108_v15 }
  0x9d   :  { %v128_v18 = vunpack.c.l.b16 %v112_v16 }
  0x9e   :  { %v90_v20 = vpop.f32.mrf.mxu0 }
  0x9f   :  { %v131_v21 = vpack.c.b16 %v128_v18, %v127_v17  ;;  %v105_v22 = vadd.f32 %v780_v19, %v90_v20 }
  0xa1   :  { %761 = vmatmul.msk.bf16.vlgmr.msra.gmra.mxu1 %vm145_vm1, %v131_v21  ;;  %v109_v23 = vmax.f32 %v105_v22, 0.0 }
  0xa3   :  { %v113_v26 = vpack.c.bf16 %v109_v23, %v109_v23 }
  0xa5   :  { %v129_v29 = vunpack.c.l.b16 %v113_v26 }
  0xa6   :  { %v92_v24 = vpop.f32.mrf.mxu0 }
  0xa7   :  { %v106_v25 = vadd.f32 %v780_v19, %v92_v24 }
  0xa9   :  { %v110_v27 = vmax.f32 %v106_v25, 0.0 }
  0xab   :  { %v114_v28 = vpack.c.bf16 %v110_v27, %v110_v27 }
  0xad   :  { %v130_v30 = vunpack.c.l.b16 %v114_v28 }
  0xaf   :  { %v132_v31 = vpack.c.b16 %v130_v30, %v129_v29 }
  0xb1   :  { %762 = vmatmul.msk.bf16.gmra.mxu1 %vm145_vm1, %v132_v31 }
 0x11e   :  { %v161_v32 = vpop.f32.mrf.mxu1 }
 0x11f   :  { %v162_v36 = vadd.f32 %v781_v33, %v161_v32 }
 0x121   :  { %v171_v38 = vmax.f32 %v162_v36, 0.0 }
 0x126   :  { %v163_v34 = vpop.f32.mrf.mxu1 }
 0x127   :  { %v164_v35 = vadd.f32 %v781_v33, %v163_v34 }
 0x129   :  { %v172_v37 = vmax.f32 %v164_v35, 0.0 }
 0x12b   :  { %763 = vmatpush.xpose.msk.msra.mxu2 %vm145_vm1, %v172_v37 }
 0x12e   :  { %v166_v39 = vpop.f32.mrf.mxu1 }
 0x12f   :  { %764 = vmatpush.xpose.msk.msra.mxu2 %vm145_vm1, %v171_v38  ;;  %v167_v42 = vadd.f32 %v781_v33, %v166_v39 }
 0x131   :  { %v173_v44 = vmax.f32 %v167_v42, 0.0 }
 0x132   :  { %765 = vmatmul.msk.f32.vlgmr.msra.gmra.mxu2 %vm145_vm1, %v171_v38 }
 0x136   :  { %v168_v40 = vpop.f32.mrf.mxu1 }
 0x137   :  { %v169_v41 = vadd.f32 %v781_v33, %v168_v40 }
 0x139   :  { %v174_v43 = vmax.f32 %v169_v41, 0.0 }
 0x13a   :  { %766 = vmatmul.msk.f32.gmra.mxu2 %vm145_vm1, %v172_v37 }
 0x13b   :  { %767 = vmatpush.xpose.msk.msra.mxu3 %vm145_vm1, %v174_v43 }
 0x13f   :  { %768 = vmatpush.xpose.msk.msra.mxu3 %vm145_vm1, %v173_v44 }
 0x142   :  { %769 = vmatmul.msk.f32.vlgmr.msra.gmra.mxu3 %vm145_vm1, %v173_v44 }
 0x14a   :  { %770 = vmatmul.msk.f32.gmra.mxu3 %vm145_vm1, %v174_v43 }
 0x1b5   :  { %v198_v47 = vpop.f32.mrf.mxu2 }
 0x1b6   :  { %v879_v48 = vsel %vm235_vm2, %v198_v47, -inf }
 0x1b7   :  { %v243_v49 = vsel %vm242_vm3, %v879_v48, -inf }
 0x1b8   :  { %244 = vmax.xlane.f32.xlu0 %v243_v49 }
 0x1bd   :  { %v201_v50 = vpop.f32.mrf.mxu2 }
 0x1be   :  { %v883_v51 = vsel %vm235_vm2, %v201_v50, -inf }
 0x1bf   :  { %v246_v52 = vsel %vm242_vm3, %v883_v51, -inf }
 0x1c0   :  { %247 = vmax.xlane.f32.xlu0 %v246_v52 }
 0x1c5   :  { %v227_v53 = vpop.f32.mrf.mxu3 }
 0x1c6   :  { %v887_v54 = vsel %vm235_vm2, %v227_v53, -inf }
 0x1c7   :  { %v249_v55 = vsel %vm242_vm3, %v887_v54, -inf }
 0x1c8   :  { %250 = vmax.xlane.f32.xlu1 %v249_v55 }
 0x1cd   :  { %v230_v56 = vpop.f32.mrf.mxu3 }
 0x1ce   :  { %v891_v57 = vsel %vm235_vm2, %v230_v56, -inf }
 0x1cf   :  { %v252_v58 = vsel %vm242_vm3, %v891_v57, -inf }
 0x1d0   :  { %253 = vmax.xlane.f32.xlu1 %v252_v58 }
 0x22b   :  { %v895_v59 = vpop.xlane.xlu0 %244 }
 0x22c   :  { %vm255_vm4 = vcmp.eq.f32.partialorder %v879_v48, %v895_v59 }
 0x22d   :  { %v259_v60 = vsel %vm255_vm4, %v876_v46, 16 }
 0x22e   :  { %v263_v61 = vsel %vm242_vm3, %v259_v60, 2147483647 }
 0x22f   :  { %v265_v62 = vshra.s32 %v263_v61, 16  ;;  %v264_v15 = vand.u32 65535, %v263_v61 }
 0x231   :  { %v267_v63 = vcvt.s32.f32 %v265_v62  ;;  %v266_v17 = vcvt.s32.f32 %v264_v15 }
 0x233   :  { %268 = vmin.xlane.f32.xlu2 %v267_v63  ;;  %v901_v0 = vpop.xlane.xlu0 %247 }
 0x234   :  { %vm256_vm5 = vcmp.eq.f32.partialorder %v883_v51, %v901_v0 }
 0x235   :  { %v260_v1 = vsel %vm256_vm5, %v876_v46, 16 }
 0x236   :  { %v278_v2 = vsel %vm242_vm3, %v260_v1, 2147483647 }
 0x237   :  { %v280_v3 = vshra.s32 %v278_v2, 16  ;;  %v279_v19 = vand.u32 65535, %v278_v2 }
 0x239   :  { %v282_v4 = vcvt.s32.f32 %v280_v3  ;;  %v281_v21 = vcvt.s32.f32 %v279_v19 }
 0x23b   :  { %283 = vmin.xlane.f32.xlu2 %v282_v4  ;;  %v907_v5 = vpop.xlane.xlu1 %250 }
 0x23c   :  { %vm257_vm6 = vcmp.eq.f32.partialorder %v887_v54, %v907_v5 }
 0x23d   :  { %v261_v6 = vsel %vm257_vm6, %v876_v46, 16 }
 0x23e   :  { %v293_v7 = vsel %vm242_vm3, %v261_v6, 2147483647 }
 0x23f   :  { %v295_v8 = vshra.s32 %v293_v7, 16  ;;  %v294_v23 = vand.u32 65535, %v293_v7 }
 0x241   :  { %v297_v9 = vcvt.s32.f32 %v295_v8  ;;  %v296_v25 = vcvt.s32.f32 %v294_v23 }
 0x243   :  { %298 = vmin.xlane.f32.xlu0 %v297_v9  ;;  %v913_v10 = vpop.xlane.xlu1 %253 }
 0x244   :  { %vm258_vm7 = vcmp.eq.f32.partialorder %v891_v57, %v913_v10 }
 0x245   :  { %v262_v11 = vsel %vm258_vm7, %v876_v46, 16 }
 0x246   :  { %v308_v12 = vsel %vm242_vm3, %v262_v11, 2147483647 }
 0x247   :  { %v310_v13 = vshra.s32 %v308_v12, 16  ;;  %v309_v27 = vand.u32 65535, %v308_v12 }
 0x249   :  { %v312_v14 = vcvt.s32.f32 %v310_v13  ;;  %v311_v29 = vcvt.s32.f32 %v309_v27 }
 0x24b   :  { %313 = vmin.xlane.f32.xlu1 %v312_v14 }
 0x2a6   :  { %v269_v16 = vpop.xlane.xlu2 %268 }
 0x2a7   :  { %vm270_vm8 = vcmp.eq.f32.partialorder %v267_v63, %v269_v16  ;;  %v275_v31 = vcvt.f32.s32 %v269_v16 }
 0x2a8   :  { %v271_v18 = vsel %vm270_vm8, %v266_v17, inf }
 0x2a9   :  { %272 = vmin.xlane.f32.xlu2 %v271_v18  ;;  %v276_v33 = vshll.u32 %v275_v31, 16 }
 0x2ae   :  { %v284_v20 = vpop.xlane.xlu2 %283 }
 0x2af   :  { %vm285_vm9 = vcmp.eq.f32.partialorder %v282_v4, %v284_v20  ;;  %v290_v36 = vcvt.f32.s32 %v284_v20 }
 0x2b0   :  { %v286_v22 = vsel %vm285_vm9, %v281_v21, inf }
 0x2b1   :  { %287 = vmin.xlane.f32.xlu0 %v286_v22  ;;  %v291_v40 = vshll.u32 %v290_v36, 16 }
 0x2b6   :  { %v299_v24 = vpop.xlane.xlu0 %298 }
 0x2b7   :  { %vm300_vm10 = vcmp.eq.f32.partialorder %v297_v9, %v299_v24  ;;  %v305_v43 = vcvt.f32.s32 %v299_v24 }
 0x2b8   :  { %v301_v26 = vsel %vm300_vm10, %v296_v25, inf }
 0x2b9   :  { %302 = vmin.xlane.f32.xlu1 %v301_v26 }
 0x2be   :  { %v314_v28 = vpop.xlane.xlu1 %313 }
 0x2bf   :  { %vm315_vm11 = vcmp.eq.f32.partialorder %v312_v14, %v314_v28  ;;  %v320_v52 = vcvt.f32.s32 %v314_v28 }
 0x2c0   :  { %v316_v30 = vsel %vm315_vm11, %v311_v29, inf }
 0x2c1   :  { %317 = vmin.xlane.f32.xlu2 %v316_v30  ;;  %v321_v56 = vshll.u32 %v320_v52, 16 }
 0x31c   :  { %v273_v32 = vpop.xlane.xlu2 %272 }
 0x31d   :  { %v274_v34 = vcvt.f32.s32 %v273_v32 }
 0x31f   :  { %v919_v35 = vadd.s32 %v276_v33, %v274_v34 }
 0x321   :  { %vm323_vm12 = vcmp.eq.s32.totalorder %v876_v46, %v919_v35 }
 0x322   :  { %v924_v37 = vsel %vm323_vm12, -inf, %v879_v48  ;;  %v306_v48 = vshll.u32 %v305_v43, 16 }
 0x323   :  { %v331_v38 = vsel %vm242_vm3, %v924_v37, -inf }
 0x324   :  { %332 = vmax.xlane.f32.xlu0 %v331_v38  ;;  %v288_v39 = vpop.xlane.xlu0 %287 }
 0x325   :  { %v289_v41 = vcvt.f32.s32 %v288_v39 }
 0x327   :  { %v928_v42 = vadd.s32 %v291_v40, %v289_v41 }
 0x329   :  { %vm324_vm13 = vcmp.eq.s32.totalorder %v876_v46, %v928_v42 }
 0x32a   :  { %v933_v44 = vsel %vm324_vm13, -inf, %v883_v51  ;;  %vm587_vm13 = vcmask 7168  }
 0x32b   :  { %v334_v45 = vsel %vm242_vm3, %v933_v44, -inf }
 0x32c   :  { %335 = vmax.xlane.f32.xlu1 %v334_v45  ;;  %v303_v47 = vpop.xlane.xlu1 %302 }
 0x32d   :  { %v304_v49 = vcvt.f32.s32 %v303_v47 }
 0x32f   :  { %v937_v50 = vadd.s32 %v306_v48, %v304_v49 }
 0x331   :  { %vm325_vm14 = vcmp.eq.s32.totalorder %v876_v46, %v937_v50 }
 0x332   :  { %v942_v53 = vsel %vm325_vm14, -inf, %v887_v54  ;;  %vm592_vm14 = vcmask 15360  }
 0x333   :  { %v337_v51 = vsel %vm242_vm3, %v942_v53, -inf }
 0x334   :  { %338 = vmax.xlane.f32.xlu2 %v337_v51  ;;  %v318_v55 = vpop.xlane.xlu2 %317 }
 0x335   :  { %v319_v58 = vcvt.f32.s32 %v318_v55 }
 0x337   :  { %v946_v60 = vadd.s32 %v321_v56, %v319_v58 }
 0x339   :  { %vm326_vm15 = vcmp.eq.s32.totalorder %v876_v46, %v946_v60 }
 0x33a   :  { %v951_v61 = vsel %vm326_vm15, -inf, %v891_v57 }
 0x33b   :  { %v340_v62 = vsel %vm242_vm3, %v951_v61, -inf }
 0x33c   :  { %341 = vmax.xlane.f32.xlu0 %v340_v62 }
 0x397   :  { %v955_v54 = vpop.xlane.xlu0 %332 }
 0x398   :  { %vm343_vm0 = vcmp.eq.f32.partialorder %v924_v37, %v955_v54 }
 0x399   :  { %v347_v63 = vsel %vm343_vm0, %v876_v46, 16 }
 0x39a   :  { %v351_v1 = vsel %vm242_vm3, %v347_v63, 2147483647 }
 0x39b   :  { %v353_v2 = vshra.s32 %v351_v1, 16  ;;  %v352_v20 = vand.u32 65535, %v351_v1 }
 0x39d   :  { %v355_v3 = vcvt.s32.f32 %v353_v2  ;;  %v354_v22 = vcvt.s32.f32 %v352_v20 }
 0x39f   :  { %356 = vmin.xlane.f32.xlu1 %v355_v3  ;;  %v961_v4 = vpop.xlane.xlu1 %335 }
 0x3a0   :  { %vm344_vm1 = vcmp.eq.f32.partialorder %v933_v44, %v961_v4 }
 0x3a1   :  { %v348_v57 = vsel %vm344_vm1, %v876_v46, 16 }
 0x3a2   :  { %v366_v6 = vsel %vm242_vm3, %v348_v57, 2147483647 }
 0x3a3   :  { %v368_v7 = vshra.s32 %v366_v6, 16  ;;  %v367_v24 = vand.u32 65535, %v366_v6 }
 0x3a5   :  { %v370_v8 = vcvt.s32.f32 %v368_v7  ;;  %v369_v26 = vcvt.s32.f32 %v367_v24 }
 0x3a7   :  { %371 = vmin.xlane.f32.xlu2 %v370_v8  ;;  %v967_v9 = vpop.xlane.xlu2 %338 }
 0x3a8   :  { %vm345_vm2 = vcmp.eq.f32.partialorder %v942_v53, %v967_v9 }
 0x3a9   :  { %v349_v11 = vsel %vm345_vm2, %v876_v46, 16 }
 0x3aa   :  { %v381_v12 = vsel %vm242_vm3, %v349_v11, 2147483647 }
 0x3ab   :  { %v383_v13 = vshra.s32 %v381_v12, 16  ;;  %v382_v28 = vand.u32 65535, %v381_v12 }
 0x3ad   :  { %v385_v14 = vcvt.s32.f32 %v383_v13  ;;  %v384_v30 = vcvt.s32.f32 %v382_v28 }
 0x3af   :  { %v973_v15 = vpop.xlane.xlu0 %341  ;;  %386 = vmin.xlane.f32.xlu0 %v385_v14 }
 0x3b0   :  { %vm346_vm4 = vcmp.eq.f32.partialorder %v951_v61, %v973_v15 }
 0x3b1   :  { %v350_v16 = vsel %vm346_vm4, %v876_v46, 16 }
 0x3b2   :  { %v396_v17 = vsel %vm242_vm3, %v350_v16, 2147483647 }
 0x3b3   :  { %v398_v18 = vshra.s32 %v396_v17, 16  ;;  %v397_v32 = vand.u32 65535, %v396_v17 }
 0x3b5   :  { %v400_v19 = vcvt.s32.f32 %v398_v18  ;;  %v399_v34 = vcvt.s32.f32 %v397_v32 }
 0x3b7   :  { %401 = vmin.xlane.f32.xlu1 %v400_v19 }
 0x412   :  { %v357_v21 = vpop.xlane.xlu1 %356 }
 0x413   :  { %vm358_vm5 = vcmp.eq.f32.partialorder %v355_v3, %v357_v21  ;;  %v363_v38 = vcvt.f32.s32 %v357_v21 }
 0x414   :  { %v359_v23 = vsel %vm358_vm5, %v354_v22, inf }
 0x415   :  { %360 = vmin.xlane.f32.xlu2 %v359_v23  ;;  %v364_v40 = vshll.u32 %v363_v38, 16 }
 0x41a   :  { %v372_v25 = vpop.xlane.xlu2 %371 }
 0x41b   :  { %vm373_vm6 = vcmp.eq.f32.partialorder %v370_v8, %v372_v25  ;;  %v378_v45 = vcvt.f32.s32 %v372_v25 }
 0x41c   :  { %v374_v27 = vsel %vm373_vm6, %v369_v26, inf }
 0x41d   :  { %375 = vmin.xlane.f32.xlu0 %v374_v27  ;;  %v379_v52 = vshll.u32 %v378_v45, 16 }
 0x422   :  { %v387_v29 = vpop.xlane.xlu0 %386 }
 0x423   :  { %vm388_vm7 = vcmp.eq.f32.partialorder %v385_v14, %v387_v29  ;;  %v393_v56 = vcvt.f32.s32 %v387_v29 }
 0x424   :  { %v389_v31 = vsel %vm388_vm7, %v384_v30, inf }
 0x425   :  { %390 = vmin.xlane.f32.xlu1 %v389_v31  ;;  %v394_v63 = vshll.u32 %v393_v56, 16 }
 0x42a   :  { %v402_v33 = vpop.xlane.xlu1 %401 }
 0x42b   :  { %vm403_vm8 = vcmp.eq.f32.partialorder %v400_v19, %v402_v33  ;;  %v408_v3 = vcvt.f32.s32 %v402_v33 }
 0x42c   :  { %v404_v36 = vsel %vm403_vm8, %v399_v34, inf }
 0x42d   :  { %405 = vmin.xlane.f32.xlu2 %v404_v36  ;;  %v409_v7 = vshll.u32 %v408_v3, 16 }
 0x488   :  { %v361_v39 = vpop.xlane.xlu2 %360 }
 0x489   :  { %v362_v41 = vcvt.f32.s32 %v361_v39 }
 0x48b   :  { %v979_v43 = vadd.s32 %v364_v40, %v362_v41 }
 0x48d   :  { %vm411_vm9 = vcmp.eq.s32.totalorder %v876_v46, %v979_v43 }
 0x48e   :  { %v984_v47 = vsel %vm411_vm9, -inf, %v924_v37 }
 0x48f   :  { %v419_v48 = vsel %vm242_vm3, %v984_v47, -inf }
 0x490   :  { %v376_v49 = vpop.xlane.xlu0 %375  ;;  %420 = vmax.xlane.f32.xlu0 %v419_v48 }
 0x491   :  { %v377_v51 = vcvt.f32.s32 %v376_v49 }
 0x493   :  { %v988_v55 = vadd.s32 %v379_v52, %v377_v51 }
 0x495   :  { %vm412_vm10 = vcmp.eq.s32.totalorder %v876_v46, %v988_v55 }
 0x496   :  { %v993_v58 = vsel %vm412_vm10, -inf, %v933_v44 }
 0x497   :  { %v422_v37 = vsel %vm242_vm3, %v993_v58, -inf }
 0x498   :  { %v391_v62 = vpop.xlane.xlu1 %390  ;;  %423 = vmax.xlane.f32.xlu1 %v422_v37 }
 0x499   :  { %v392_v1 = vcvt.f32.s32 %v391_v62 }
 0x49b   :  { %v997_v2 = vadd.s32 %v394_v63, %v392_v1 }
 0x49d   :  { %vm413_vm11 = vcmp.eq.s32.totalorder %v876_v46, %v997_v2 }
 0x49e   :  { %v1002_v57 = vsel %vm413_vm11, -inf, %v942_v53  ;;  %v588_v53 = vsel %vm587_vm13, %v895_v59, %v955_v54 }
 0x49f   :  { %v425_v44 = vsel %vm242_vm3, %v1002_v57, -inf }
 0x4a0   :  { %426 = vmax.xlane.f32.xlu2 %v425_v44  ;;  %v406_v6 = vpop.xlane.xlu2 %405 }
 0x4a1   :  { %v407_v8 = vcvt.f32.s32 %v406_v6 }
 0x4a3   :  { %v1006_v11 = vadd.s32 %v409_v7, %v407_v8  ;;  %v602_v8 = vsel %vm587_vm13, %v919_v35, %v979_v43 }
 0x4a5   :  { %vm414_vm12 = vcmp.eq.s32.totalorder %v876_v46, %v1006_v11 }
 0x4a6   :  { %v1011_v12 = vsel %vm414_vm12, -inf, %v951_v61  ;;  %vm597_vm12 = vcmask 23552  }
 0x4a7   :  { %v428_v13 = vsel %vm242_vm3, %v1011_v12, -inf }
 0x4a8   :  { %429 = vmax.xlane.f32.xlu0 %v428_v13 }
 0x503   :  { %v421_v14 = vpop.xlane.xlu0 %420 }
 0x504   :  { %vm431_vm15 = vcmp.eq.f32.partialorder %v984_v47, %v421_v14  ;;  %v1020_v16 = vsel %vm592_vm14, %v588_v53, %v421_v14 }
 0x505   :  { %v435_v17 = vsel %vm431_vm15, %v876_v46, 16  ;;  %vm614_vm15 = vcmask 31744  }
 0x506   :  { %v439_v61 = vsel %vm242_vm3, %v435_v17, 2147483647 }
 0x507   :  { %v441_v18 = vshra.s32 %v439_v61, 16  ;;  %v440_v33 = vand.u32 65535, %v439_v61 }
 0x509   :  { %v443_v19 = vcvt.s32.f32 %v441_v18  ;;  %v442_v36 = vcvt.s32.f32 %v440_v33 }
 0x50b   :  { %v1024_v20 = vpop.xlane.xlu1 %423  ;;  %444 = vmin.xlane.f32.xlu1 %v443_v19 }
 0x50c   :  { %vm432_vm0 = vcmp.eq.f32.partialorder %v993_v58, %v1024_v20 }
 0x50d   :  { %v436_v59 = vsel %vm432_vm0, %v876_v46, 16 }
 0x50e   :  { %v454_v54 = vsel %vm242_vm3, %v436_v59, 2147483647 }
 0x50f   :  { %v456_v21 = vshra.s32 %v454_v54, 16  ;;  %v455_v39 = vand.u32 65535, %v454_v54  ;;  %v603_v54 = vsel %vm587_vm13, %v928_v42, %v988_v55 }
 0x511   :  { %v458_v22 = vcvt.s32.f32 %v456_v21  ;;  %v457_v41 = vcvt.s32.f32 %v455_v39 }
 0x513   :  { %459 = vmin.xlane.f32.xlu2 %v458_v22  ;;  %v1030_v23 = vpop.xlane.xlu2 %426 }
 0x514   :  { %vm433_vm1 = vcmp.eq.f32.partialorder %v1002_v57, %v1030_v23 }
 0x515   :  { %v437_v24 = vsel %vm433_vm1, %v876_v46, 16 }
 0x516   :  { %v469_v25 = vsel %vm242_vm3, %v437_v24, 2147483647 }
 0x517   :  { %v471_v26 = vshra.s32 %v469_v25, 16  ;;  %v470_v48 = vand.u32 65535, %v469_v25 }
 0x519   :  { %v473_v27 = vcvt.s32.f32 %v471_v26  ;;  %v472_v52 = vcvt.s32.f32 %v470_v48 }
 0x51b   :  { %v1036_v28 = vpop.xlane.xlu0 %429  ;;  %474 = vmin.xlane.f32.xlu0 %v473_v27 }
 0x51c   :  { %vm434_vm2 = vcmp.eq.f32.partialorder %v1011_v12, %v1036_v28 }
 0x51d   :  { %v438_v29 = vsel %vm434_vm2, %v876_v46, 16 }
 0x51e   :  { %v484_v30 = vsel %vm242_vm3, %v438_v29, 2147483647 }
 0x51f   :  { %v486_v31 = vshra.s32 %v484_v30, 16  ;;  %v485_v56 = vand.u32 65535, %v484_v30 }
 0x521   :  { %v488_v32 = vcvt.s32.f32 %v486_v31  ;;  %v487_v62 = vcvt.s32.f32 %v485_v56 }
 0x523   :  { %489 = vmin.xlane.f32.xlu1 %v488_v32 }
 0x57e   :  { %v445_v34 = vpop.xlane.xlu1 %444 }
 0x57f   :  { %vm446_vm4 = vcmp.eq.f32.partialorder %v443_v19, %v445_v34  ;;  %v451_v1 = vcvt.f32.s32 %v445_v34  ;;  %v605_v34 = vsel %vm587_vm13, %v946_v60, %v1006_v11  ;;  %v589_v60 = vsel %vm587_vm13, %v901_v0, %v961_v4 }
 0x580   :  { %v447_v38 = vsel %vm446_vm4, %v442_v36, inf }
 0x581   :  { %448 = vmin.xlane.f32.xlu2 %v447_v38  ;;  %v452_v44 = vshll.u32 %v451_v1, 16 }
 0x586   :  { %v460_v40 = vpop.xlane.xlu2 %459 }
 0x587   :  { %vm461_vm5 = vcmp.eq.f32.partialorder %v458_v22, %v460_v40  ;;  %v466_v13 = vcvt.f32.s32 %v460_v40 }
 0x588   :  { %v462_v45 = vsel %vm461_vm5, %v457_v41, inf }
 0x589   :  { %463 = vmin.xlane.f32.xlu0 %v462_v45  ;;  %v467_v18 = vshll.u32 %v466_v13, 16 }
 0x58e   :  { %v475_v49 = vpop.xlane.xlu0 %474 }
 0x58f   :  { %vm476_vm6 = vcmp.eq.f32.partialorder %v473_v27, %v475_v49  ;;  %v481_v35 = vcvt.f32.s32 %v475_v49  ;;  %v604_v27 = vsel %vm587_vm13, %v937_v50, %v997_v2  ;;  %v590_v49 = vsel %vm587_vm13, %v907_v5, %v967_v9 }
 0x590   :  { %v477_v51 = vsel %vm476_vm6, %v472_v52, inf  ;;  %v595_v4 = vsel %vm592_vm14, %v590_v49, %v1030_v23  ;;  %v591_v5 = vsel %vm587_vm13, %v913_v10, %v973_v15 }
 0x591   :  { %478 = vmin.xlane.f32.xlu1 %v477_v51  ;;  %v482_v24 = vshll.u32 %v481_v35, 16  ;;  %v596_v23 = vsel %vm592_vm14, %v591_v5, %v1036_v28 }
 0x596   :  { %v490_v37 = vpop.xlane.xlu1 %489 }
 0x597   :  { %vm491_vm7 = vcmp.eq.f32.partialorder %v488_v32, %v490_v37  ;;  %v496_v42 = vcvt.f32.s32 %v490_v37 }
 0x598   :  { %v492_v63 = vsel %vm491_vm7, %v487_v62, inf }
 0x599   :  { %493 = vmin.xlane.f32.xlu2 %v492_v63  ;;  %v497_v31 = vshll.u32 %v496_v42, 16 }
 0x5f4   :  { %v449_v3 = vpop.xlane.xlu2 %448 }
 0x5f5   :  { %v450_v6 = vcvt.f32.s32 %v449_v3 }
 0x5f7   :  { %v453_v7 = vadd.s32 %v452_v44, %v450_v6 }
 0x5f9   :  { %v1046_v53 = vsel %vm592_vm14, %v602_v8, %v453_v7  ;;  %vm499_vm8 = vcmp.eq.s32.totalorder %v876_v46, %v453_v7 }
 0x5fa   :  { %v503_v14 = vsel %vm499_vm8, -inf, %v984_v47 }
 0x5fb   :  { %v507_v17 = vsel %vm242_vm3, %v503_v14, -inf }
 0x5fc   :  { %v464_v61 = vpop.xlane.xlu0 %463  ;;  %508 = vmax.xlane.f32.xlu0 %v507_v17 }
 0x5fd   :  { %v465_v19 = vcvt.f32.s32 %v464_v61 }
 0x5ff   :  { %v468_v59 = vadd.s32 %v467_v18, %v465_v19 }
 0x601   :  { %v1055_v43 = vsel %vm592_vm14, %v603_v54, %v468_v59  ;;  %vm500_vm9 = vcmp.eq.s32.totalorder %v876_v46, %v468_v59 }
 0x602   :  { %v504_v21 = vsel %vm500_vm9, -inf, %v993_v58 }
 0x603   :  { %v510_v47 = vsel %vm242_vm3, %v504_v21, -inf }
 0x604   :  { %v479_v22 = vpop.xlane.xlu1 %478  ;;  %511 = vmax.xlane.f32.xlu1 %v510_v47 }
 0x605   :  { %v480_v25 = vcvt.f32.s32 %v479_v22 }
 0x607   :  { %v483_v26 = vadd.s32 %v482_v24, %v480_v25 }
 0x609   :  { %v1064_v55 = vsel %vm592_vm14, %v604_v27, %v483_v26  ;;  %vm501_vm10 = vcmp.eq.s32.totalorder %v876_v46, %v483_v26 }
 0x60a   :  { %v505_v29 = vsel %vm501_vm10, -inf, %v1002_v57 }
 0x60b   :  { %v513_v58 = vsel %vm242_vm3, %v505_v29, -inf }
 0x60c   :  { %514 = vmax.xlane.f32.xlu2 %v513_v58  ;;  %v494_v30 = vpop.xlane.xlu2 %493 }
 0x60d   :  { %v495_v32 = vcvt.f32.s32 %v494_v30 }
 0x60f   :  { %v498_v33 = vadd.s32 %v497_v31, %v495_v32 }
 0x611   :  { %v1073_v50 = vsel %vm592_vm14, %v605_v34, %v498_v33  ;;  %vm502_vm11 = vcmp.eq.s32.totalorder %v876_v46, %v498_v33 }
 0x612   :  { %v506_v2 = vsel %vm502_vm11, -inf, %v1011_v12  ;;  %v594_v12 = vsel %vm592_vm14, %v589_v60, %v1024_v20 }
 0x613   :  { %v516_v57 = vsel %vm242_vm3, %v506_v2, -inf }
 0x614   :  { %517 = vmax.xlane.f32.xlu0 %v516_v57 }
 0x66f   :  { %v509_v36 = vpop.xlane.xlu0 %508 }
 0x670   :  { %v598_v38 = vsel %vm597_vm12, %v1020_v16, %v509_v36  ;;  %vm519_vm0 = vcmp.eq.f32.partialorder %v503_v14, %v509_v36 }
 0x671   :  { %v615_v39 = vsel %vm614_vm15, %v598_v38, -inf  ;;  %v523_v11 = vsel %vm519_vm0, %v876_v46, 16 }
 0x672   :  { %616 = vmax.xlane.f32.xlu1 %v615_v39  ;;  %v527_v16 = vsel %vm242_vm3, %v523_v11, 2147483647 }
 0x673   :  { %v529_v48 = vshra.s32 %v527_v16, 16  ;;  %v528_v26 = vand.u32 65535, %v527_v16 }
 0x675   :  { %v531_v52 = vcvt.s32.f32 %v529_v48 }
 0x677   :  { %v512_v40 = vpop.xlane.xlu1 %511 }
 0x678   :  { %v599_v41 = vsel %vm597_vm12, %v594_v12, %v512_v40  ;;  %vm520_vm1 = vcmp.eq.f32.partialorder %v504_v21, %v512_v40 }
 0x679   :  { %v618_v45 = vsel %vm614_vm15, %v599_v41, -inf  ;;  %v524_v0 = vsel %vm520_vm1, %v876_v46, 16 }
 0x67a   :  { %619 = vmax.xlane.f32.xlu2 %v618_v45  ;;  %v542_v37 = vsel %vm242_vm3, %v524_v0, 2147483647 }
 0x67b   :  { %v544_v62 = vshra.s32 %v542_v37, 16  ;;  %v543_v34 = vand.u32 65535, %v542_v37 }
 0x67d   :  { %v546_v3 = vcvt.s32.f32 %v544_v62  ;;  %v545_v36 = vcvt.s32.f32 %v543_v34 }
 0x67f   :  { %v515_v20 = vpop.xlane.xlu2 %514 }
 0x680   :  { %v600_v51 = vsel %vm597_vm12, %v595_v4, %v515_v20  ;;  %vm521_vm2 = vcmp.eq.f32.partialorder %v505_v29, %v515_v20  ;;  %v530_v29 = vcvt.s32.f32 %v528_v26 }
 0x681   :  { %v621_v56 = vsel %vm614_vm15, %v600_v51, -inf  ;;  %v525_v9 = vsel %vm521_vm2, %v876_v46, 16 }
 0x682   :  { %532 = vmin.xlane.f32.xlu2 %v531_v52  ;;  %622 = vmax.xlane.f32.xlu0 %v621_v56  ;;  %v557_v7 = vsel %vm242_vm3, %v525_v9, 2147483647 }
 0x683   :  { %v559_v8 = vshra.s32 %v557_v7, 16 }
 0x685   :  { %v561_v28 = vcvt.s32.f32 %v559_v8 }
 0x687   :  { %v518_v63 = vpop.xlane.xlu0 %517 }
 0x688   :  { %vm522_vm4 = vcmp.eq.f32.partialorder %v506_v2, %v518_v63  ;;  %v601_v1 = vsel %vm597_vm12, %v596_v23, %v518_v63 }
 0x689   :  { %v526_v44 = vsel %vm522_vm4, %v876_v46, 16  ;;  %v624_v6 = vsel %vm614_vm15, %v601_v1, -inf }
 0x68a   :  { %625 = vmax.xlane.f32.xlu1 %v624_v6  ;;  %547 = vmin.xlane.f32.xlu0 %v546_v3  ;;  %v572_v10 = vsel %vm242_vm3, %v526_v44, 2147483647 }
 0x68b   :  { %v574_v15 = vshra.s32 %v572_v10, 16  ;;  %v573_v57 = vand.u32 65535, %v572_v10 }
 0x68d   :  { %v576_v13 = vcvt.s32.f32 %v574_v15  ;;  %v575_v39 = vcvt.s32.f32 %v573_v57 }
 0x68f   :  { %577 = vmin.xlane.f32.xlu2 %v576_v13 }
 0x692   :  { %562 = vmin.xlane.f32.xlu1 %v561_v28 }
 0x6e5   :  { %v617_v14 = vpop.xlane.xlu1 %616 }
 0x6e6   :  { %v627_v17 = vsub.f32 %v598_v38, %v617_v14 }
 0x6e8   :  { %v631_v61 = vmul.f32 1.442695, %v627_v17 }
 0x6ea   :  { %782 = vpow2.f32 %v631_v61 }
 0x6ed   :  { %v620_v18 = vpop.xlane.xlu2 %619 }
 0x6ee   :  { %v628_v46 = vsub.f32 %v599_v41, %v620_v18  ;;  %v558_v41 = vand.u32 65535, %v557_v7 }
 0x6f0   :  { %v1110_v19 = vpop.eup %782  ;;  %v633_v59 = vmul.f32 1.442695, %v628_v46  ;;  %v560_v45 = vcvt.s32.f32 %v558_v41 }
 0x6f1   :  { %v639_v54 = vsel %vm614_vm15, %v1110_v19, 0.0 }
 0x6f2   :  { %784 = vpow2.f32 %v633_v59  ;;  %640 = vadd.xlane.f32.xlu0 %v639_v54 }
 0x6f5   :  { %v623_v35 = vpop.xlane.xlu0 %622  ;;  %v533_v25 = vpop.xlane.xlu2 %532 }
 0x6f6   :  { %v629_v21 = vsub.f32 %v600_v51, %v623_v35  ;;  %vm534_vm3 = vcmp.eq.f32.partialorder %v531_v52, %v533_v25  ;;  %v539_v37 = vcvt.f32.s32 %v533_v25 }
 0x6f7   :  { %v535_v32 = vsel %vm534_vm3, %v530_v29, inf }
 0x6f8   :  { %v1114_v47 = vpop.eup %784  ;;  %v635_v22 = vmul.f32 1.442695, %v629_v21  ;;  %v540_v44 = vshll.u32 %v539_v37, 16 }
 0x6f9   :  { %v642_v24 = vsel %vm614_vm15, %v1114_v47, 0.0 }
 0x6fa   :  { %786 = vpow2.f32 %v635_v22  ;;  %643 = vadd.xlane.f32.xlu1 %v642_v24 }
 0x6fd   :  { %v626_v27 = vpop.xlane.xlu1 %625  ;;  %v1122_v33 = vpop.xlane.xlu0 %547 }
 0x6fe   :  { %v630_v42 = vsub.f32 %v601_v1, %v626_v27  ;;  %vm549_vm13 = vcmp.eq.f32.partialorder %v546_v3, %v1122_v33 }
 0x6ff   :  { %v550_v11 = vsel %vm549_vm13, %v545_v36, inf }
 0x700   :  { %v1118_v58 = vpop.eup %786  ;;  %v637_v30 = vmul.f32 1.442695, %v630_v42 }
 0x701   :  { %v645_v31 = vsel %vm614_vm15, %v1118_v58, 0.0 }
 0x702   :  { %788 = vpow2.f32 %v637_v30  ;;  %646 = vadd.xlane.f32.xlu2 %v645_v31  ;;  %536 = vmin.xlane.f32.xlu1 %v535_v32  ;;  %v1124_v2 = vpop.xlane.xlu2 %577 }
 0x703   :  { %vm579_vm14 = vcmp.eq.f32.partialorder %v576_v13, %v1124_v2  ;;  %v584_v61 = vcvt.f32.s32 %v1124_v2 }
 0x704   :  { %v580_v12 = vsel %vm579_vm14, %v575_v39, inf }
 0x705   :  { %v1132_v40 = vpop.xlane.xlu1 %562  ;;  %v585_v25 = vshll.u32 %v584_v61, 16 }
 0x706   :  { %vm564_vm5 = vcmp.eq.f32.partialorder %v561_v28, %v1132_v40  ;;  %v569_v2 = vcvt.f32.s32 %v1132_v40 }
 0x707   :  { %v565_v16 = vsel %vm564_vm5, %v560_v45, inf }
 0x708   :  { %v1128_v38 = vpop.eup %788  ;;  %v570_v41 = vshll.u32 %v569_v2, 16 }
 0x709   :  { %v648_v60 = vsel %vm614_vm15, %v1128_v38, 0.0 }
 0x70a   :  { %649 = vadd.xlane.f32.xlu0 %v648_v60  ;;  %551 = vmin.xlane.f32.xlu2 %v550_v11 }
 0x70b   :  { %581 = vmin.xlane.f32.xlu1 %v580_v12 }
 0x712   :  { %566 = vmin.xlane.f32.xlu0 %v565_v16 }
 0x765   :  { %v641_v48 = vpop.xlane.xlu0 %640 }
 0x766   :  { %790 = vrcp.f32 %v641_v48  ;;  %v662_v52 = vand.u32 2147483648, %v641_v48  ;;  %v660_v56 = vand.u32 2147483647, %v641_v48  ;;  %vm656_vm7 = vweird.f32 %v641_v48 }
 0x768   :  { %v663_v9 = vor.u32 1.1754944e-38, %v662_v52  ;;  %vm661_vm9 = vcmp.eq.f32.partialorder %v660_v56, 8.507059e+37 }
 0x76c   :  { %v791_v49 = vpop.eup %790 }
 0x76d   :  { %v652_v0 = vmul.f32 %v791_v49, %v641_v48  ;;  %v644_v4 = vpop.xlane.xlu1 %643  ;;  %vm657_vm6 = vweird.f32 %v791_v49 }
 0x76e   :  { %792 = vrcp.f32 %v644_v4  ;;  %vm658_vm8 = vmor %vm656_vm7, %vm657_vm6  ;;  %v677_v8 = vand.u32 2147483648, %v644_v4  ;;  %v675_v14 = vand.u32 2147483647, %v644_v4  ;;  %vm671_vm11 = vweird.f32 %v644_v4 }
 0x76f   :  { %v653_v20 = vsub.f32 1.0, %v652_v0 }
 0x770   :  { %v678_v59 = vor.u32 1.1754944e-38, %v677_v8  ;;  %vm676_vm1 = vcmp.eq.f32.partialorder %v675_v14, 8.507059e+37 }
 0x771   :  { %v654_v51 = vmul.f32 %v791_v49, %v653_v20 }
 0x773   :  { %v655_v62 = vadd.f32 %v791_v49, %v654_v51 }
 0x774   :  { %v793_v5 = vpop.eup %792 }
 0x775   :  { %v659_v23 = vsel %vm658_vm8, %v791_v49, %v655_v62  ;;  %v667_v63 = vmul.f32 %v793_v5, %v644_v4  ;;  %v537_v1 = vpop.xlane.xlu1 %536  ;;  %v647_v3 = vpop.xlane.xlu2 %646  ;;  %vm672_vm10 = vweird.f32 %v793_v5 }
 0x776   :  { %v664_v6 = vsel %vm661_vm9, %v663_v9, %v659_v23  ;;  %v538_v7 = vcvt.f32.s32 %v537_v1  ;;  %794 = vrcp.f32 %v647_v3  ;;  %vm673_vm0 = vmor %vm671_vm11, %vm672_vm10  ;;  %v692_v30 = vand.u32 2147483648, %v647_v3 }
 0x777   :  { %v665_v10 = vmul.f32 %v1110_v19, %v664_v6  ;;  %v668_v15 = vsub.f32 1.0, %v667_v63  ;;  %v554_v19 = vcvt.f32.s32 %v1122_v33  ;;  %v690_v33 = vand.u32 2147483647, %v647_v3 }
 0x778   :  { %v541_v13 = vadd.s32 %v540_v44, %v538_v7  ;;  %vm686_vm4 = vweird.f32 %v647_v3  ;;  %v693_v60 = vor.u32 1.1754944e-38, %v692_v30 }
 0x779   :  { %711 = vst.msk [vmem:[%s1187_s5] sm:$0xff] %vm614_vm15, %v665_v10  ;;  %v669_v28 = vmul.f32 %v793_v5, %v668_v15  ;;  %v555_v29 = vshll.u32 %v554_v19, 16  ;;  %vm691_vm13 = vcmp.eq.f32.partialorder %v690_v33, 8.507059e+37 }
 0x77a   :  { %v610_v17 = vsel %vm597_vm12, %v1046_v53, %v541_v13 }
 0x77b   :  { %v670_v18 = vadd.f32 %v793_v5, %v669_v28  ;;  %715 = vst.msk [vmem:[%s1188_s6] sm:$0xff] %vm614_vm15, %v610_v17 }
 0x77c   :  { %v795_v46 = vpop.eup %794 }
 0x77d   :  { %v674_v54 = vsel %vm673_vm0, %v793_v5, %v670_v18  ;;  %v682_v35 = vmul.f32 %v795_v46, %v647_v3  ;;  %v650_v21 = vpop.xlane.xlu0 %649  ;;  %v552_v22 = vpop.xlane.xlu2 %551  ;;  %vm687_vm2 = vweird.f32 %v795_v46 }
 0x77e   :  { %v679_v53 = vsel %vm676_vm1, %v678_v59, %v674_v54  ;;  %796 = vrcp.f32 %v650_v21  ;;  %v582_v24 = vpop.xlane.xlu1 %581  ;;  %v553_v31 = vcvt.f32.s32 %v552_v22  ;;  %vm688_vm3 = vmor %vm686_vm4, %vm687_vm2  ;;  %v707_v0 = vand.u32 2147483648, %v650_v21 }
 0x77f   :  { %v680_v26 = vmul.f32 %v1114_v47, %v679_v53  ;;  %v683_v27 = vsub.f32 1.0, %v682_v35  ;;  %v583_v42 = vcvt.f32.s32 %v582_v24  ;;  %v705_v20 = vand.u32 2147483647, %v650_v21 }
 0x780   :  { %v556_v57 = vadd.s32 %v555_v29, %v553_v31  ;;  %vm701_vm5 = vweird.f32 %v650_v21 }
 0x781   :  { %712 = vst.msk [vmem:[%s1187_s5 + $0x8] sm:$0xff] %vm614_vm15, %v680_v26  ;;  %v684_v32 = vmul.f32 %v795_v46, %v683_v27  ;;  %v586_v34 = vadd.s32 %v585_v25, %v583_v42  ;;  %vm706_vm7 = vcmp.eq.f32.partialorder %v705_v20, 8.507059e+37 }
 0x782   :  { %v611_v11 = vsel %vm597_vm12, %v1055_v43, %v556_v57 }
 0x783   :  { %v685_v36 = vadd.f32 %v795_v46, %v684_v32  ;;  %v613_v47 = vsel %vm597_vm12, %v1073_v50, %v586_v34  ;;  %716 = vst.msk [vmem:[%s1188_s6 + $0x8] sm:$0xff] %vm614_vm15, %v611_v11 }
 0x784   :  { %v797_v39 = vpop.eup %796  ;;  %718 = vst.msk [vmem:[%s1188_s6 + $0x18] sm:$0xff] %vm614_vm15, %v613_v47 }
 0x785   :  { %v689_v12 = vsel %vm688_vm3, %v795_v46, %v685_v36  ;;  %v697_v40 = vmul.f32 %v797_v39, %v650_v21  ;;  %v567_v50 = vpop.xlane.xlu0 %566  ;;  %vm702_vm14 = vweird.f32 %v797_v39 }
 0x786   :  { %v694_v45 = vsel %vm691_vm13, %v693_v60, %v689_v12  ;;  %v568_v16 = vcvt.f32.s32 %v567_v50  ;;  %vm703_vm6 = vmor %vm701_vm5, %vm702_vm14 }
 0x787   :  { %v695_v48 = vmul.f32 %v1118_v58, %v694_v45  ;;  %v698_v49 = vsub.f32 1.0, %v697_v40  ;;  %v708_v58 = vor.u32 1.1754944e-38, %v707_v0 }
 0x788   :  { %v571_v4 = vadd.s32 %v570_v41, %v568_v16 }
 0x789   :  { %713 = vst.msk [vmem:[%s1187_s5 + $0x10] sm:$0xff] %vm614_vm15, %v695_v48  ;;  %v699_v43 = vmul.f32 %v797_v39, %v698_v49 }
 0x78a   :  { %v612_v52 = vsel %vm597_vm12, %v1064_v55, %v571_v4 }
 0x78b   :  { %v700_v51 = vadd.f32 %v797_v39, %v699_v43  ;;  %717 = vst.msk [vmem:[%s1188_s6 + $0x10] sm:$0xff] %vm614_vm15, %v612_v52 }
 0x78d   :  { %v704_v56 = vsel %vm703_vm6, %v797_v39, %v700_v51 }
 0x78e   :  { %v709_v37 = vsel %vm706_vm7, %v708_v58, %v704_v56 }
 0x78f   :  { %v710_v62 = vmul.f32 %v1128_v38, %v709_v37 }
 0x791   :  { %714 = vst.msk [vmem:[%s1187_s5 + $0x18] sm:$0xff] %vm614_vm15, %v710_v62 }

// kernel: tpu_custom_call.1
= control target key start
LH: loop header
LB: loop body
LE: loop exit
PB: predicated region body
PF: predicated region fallthrough
CT: control target
= control target key end

     0   :  { %vm69_vm0 = vcmask 523264   ;;  %vm145_vm1 = vcmask 261120   ;;  %v233_v45 = vlaneseq  ;;  %vm242_vm3 = vcmask 130048   ;;  %s1182_s2 = inlined_call_operand.vmem [shape: bf16[64,32], index: 2, kind: input, shape index: {}]   ;;  %s1183_s1 = inlined_call_operand.vmem [shape: f32[2,1,32], index: 1, kind: input, shape index: {}]   ;;  %s1184_s0 = inlined_call_operand.vmem [shape: bf16[2,16,64], index: 0, kind: input, shape index: {}]   ;;  %s1185_s4 = inlined_call_operand.vmem [shape: f32[1,32], index: 4, kind: input, shape index: {}]   ;;  %s1186_s3 = inlined_call_operand.vmem [shape: bf16[32,32], index: 3, kind: input, shape index: {}]   ;;  %s1187_s5 = inlined_call_operand.vmem [shape: f32[2,16,4], index: 5, kind: output, shape index: {0}]   ;;  %s1188_s6 = inlined_call_operand.vmem [shape: s32[2,16,4], index: 6, kind: output, shape index: {1}]  }
   0x1   :  { %v776_v0 = vld [vmem:[%s1182_s2 + $0x18] sm:$0xff]  ;;  %v775_v1 = vld [vmem:[%s1182_s2 + $0x10] sm:$0xff]  ;;  %v774_v2 = vld [vmem:[%s1182_s2 + $0x8] sm:$0xff] }
   0x2   :  { %80 = vmatpush.bf16.msra.mxu0 %v776_v0  ;;  %v773_v3 = vld [vmem:[%s1182_s2] sm:$0xff]  ;;  %v772_v5 = vld [vmem:[%s1184_s0 + $0x8] sm:$0xff]  ;;  %v876_v46 = vand.u32 127, %v233_v45 }
   0x3   :  { %v771_v4 = vld [vmem:[%s1184_s0] sm:$0xff]  ;;  %v778_v6 = vld [vmem:[%s1186_s3 + $0x8] sm:$0xff] }
   0x4   :  { %158 = vmatpush.bf16.msra.mxu1 %v778_v6  ;;  %v777_v7 = vld [vmem:[%s1186_s3] sm:$0xff]  ;;  %vm235_vm2 = vcmp.lt.s32.totalorder %v876_v46, 12 }
   0x5   :  { %v779_v8 = vld [vmem:[%s1183_s1] ss:$0 sm:$0xff]  ;;  %v780_v19 = vld [vmem:[%s1183_s1 + $0x1] ss:$0 sm:$0xff] }
   0x6   :  { %81 = vmatpush.bf16.msra.mxu0 %v775_v1  ;;  %v781_v33 = vld [vmem:[%s1185_s4] ss:$0 sm:$0xff] }
   0x8   :  { %159 = vmatpush.bf16.msra.mxu1 %v777_v7 }
   0xa   :  { %82 = vmatpush.bf16.msra.mxu0 %v774_v2 }
   0xe   :  { %83 = vmatpush.bf16.msra.mxu0 %v773_v3 }
  0x11   :  { %751 = vmatmul.msk.bf16.vlgmr.msra.gmra.mxu0 %vm69_vm0, %v771_v4 }
  0x21   :  { %752 = vmatmul.msk.bf16.gmra.mxu0 %vm69_vm0, %v772_v5 }
  0x8e   :  { %v85_v9 = vpop.f32.mrf.mxu0 }
  0x8f   :  { %v103_v10 = vadd.f32 %v779_v8, %v85_v9 }
  0x91   :  { %v107_v11 = vmax.f32 %v103_v10, 0.0 }
  0x93   :  { %v111_v14 = vpack.c.bf16 %v107_v11, %v107_v11 }
  0x95   :  { %v127_v17 = vunpack.c.l.b16 %v111_v14 }
  0x96   :  { %v87_v12 = vpop.f32.mrf.mxu0 }
  0x97   :  { %v104_v13 = vadd.f32 %v779_v8, %v87_v12 }
  0x99   :  { %v108_v15 = vmax.f32 %v104_v13, 0.0 }
  0x9b   :  { %v112_v16 = vpack.c.bf16 %v108_v15, %v108_v15 }
  0x9d   :  { %v128_v18 = vunpack.c.l.b16 %v112_v16 }
  0x9e   :  { %v90_v20 = vpop.f32.mrf.mxu0 }
  0x9f   :  { %v131_v21 = vpack.c.b16 %v128_v18, %v127_v17  ;;  %v105_v22 = vadd.f32 %v780_v19, %v90_v20 }
  0xa1   :  { %761 = vmatmul.msk.bf16.vlgmr.msra.gmra.mxu1 %vm145_vm1, %v131_v21  ;;  %v109_v23 = vmax.f32 %v105_v22, 0.0 }
  0xa3   :  { %v113_v26 = vpack.c.bf16 %v109_v23, %v109_v23 }
  0xa5   :  { %v129_v29 = vunpack.c.l.b16 %v113_v26 }
  0xa6   :  { %v92_v24 = vpop.f32.mrf.mxu0 }
  0xa7   :  { %v106_v25 = vadd.f32 %v780_v19, %v92_v24 }
  0xa9   :  { %v110_v27 = vmax.f32 %v106_v25, 0.0 }
  0xab   :  { %v114_v28 = vpack.c.bf16 %v110_v27, %v110_v27 }
  0xad   :  { %v130_v30 = vunpack.c.l.b16 %v114_v28 }
  0xaf   :  { %v132_v31 = vpack.c.b16 %v130_v30, %v129_v29 }
  0xb1   :  { %762 = vmatmul.msk.bf16.gmra.mxu1 %vm145_vm1, %v132_v31 }
 0x11e   :  { %v161_v32 = vpop.f32.mrf.mxu1 }
 0x11f   :  { %v162_v36 = vadd.f32 %v781_v33, %v161_v32 }
 0x121   :  { %v171_v38 = vmax.f32 %v162_v36, 0.0 }
 0x126   :  { %v163_v34 = vpop.f32.mrf.mxu1 }
 0x127   :  { %v164_v35 = vadd.f32 %v781_v33, %v163_v34 }
 0x129   :  { %v172_v37 = vmax.f32 %v164_v35, 0.0 }
 0x12b   :  { %763 = vmatpush.xpose.msk.msra.mxu2 %vm145_vm1, %v172_v37 }
 0x12e   :  { %v166_v39 = vpop.f32.mrf.mxu1 }
 0x12f   :  { %764 = vmatpush.xpose.msk.msra.mxu2 %vm145_vm1, %v171_v38  ;;  %v167_v42 = vadd.f32 %v781_v33, %v166_v39 }
 0x131   :  { %v173_v44 = vmax.f32 %v167_v42, 0.0 }
 0x132   :  { %765 = vmatmul.msk.f32.vlgmr.msra.gmra.mxu2 %vm145_vm1, %v171_v38 }
 0x136   :  { %v168_v40 = vpop.f32.mrf.mxu1 }
 0x137   :  { %v169_v41 = vadd.f32 %v781_v33, %v168_v40 }
 0x139   :  { %v174_v43 = vmax.f32 %v169_v41, 0.0 }
 0x13a   :  { %766 = vmatmul.msk.f32.gmra.mxu2 %vm145_vm1, %v172_v37 }
 0x13b   :  { %767 = vmatpush.xpose.msk.msra.mxu3 %vm145_vm1, %v174_v43 }
 0x13f   :  { %768 = vmatpush.xpose.msk.msra.mxu3 %vm145_vm1, %v173_v44 }
 0x142   :  { %769 = vmatmul.msk.f32.vlgmr.msra.gmra.mxu3 %vm145_vm1, %v173_v44 }
 0x14a   :  { %770 = vmatmul.msk.f32.gmra.mxu3 %vm145_vm1, %v174_v43 }
 0x1b5   :  { %v198_v47 = vpop.f32.mrf.mxu2 }
 0x1b6   :  { %v879_v48 = vsel %vm235_vm2, %v198_v47, -inf }
 0x1b7   :  { %v243_v49 = vsel %vm242_vm3, %v879_v48, -inf }
 0x1b8   :  { %244 = vmax.xlane.f32.xlu0 %v243_v49 }
 0x1bd   :  { %v201_v50 = vpop.f32.mrf.mxu2 }
 0x1be   :  { %v883_v51 = vsel %vm235_vm2, %v201_v50, -inf }
 0x1bf   :  { %v246_v52 = vsel %vm242_vm3, %v883_v51, -inf }
 0x1c0   :  { %247 = vmax.xlane.f32.xlu0 %v246_v52 }
 0x1c5   :  { %v227_v53 = vpop.f32.mrf.mxu3 }
 0x1c6   :  { %v887_v54 = vsel %vm235_vm2, %v227_v53, -inf }
 0x1c7   :  { %v249_v55 = vsel %vm242_vm3, %v887_v54, -inf }
 0x1c8   :  { %250 = vmax.xlane.f32.xlu1 %v249_v55 }
 0x1cd   :  { %v230_v56 = vpop.f32.mrf.mxu3 }
 0x1ce   :  { %v891_v57 = vsel %vm235_vm2, %v230_v56, -inf }
 0x1cf   :  { %v252_v58 = vsel %vm242_vm3, %v891_v57, -inf }
 0x1d0   :  { %253 = vmax.xlane.f32.xlu1 %v252_v58 }
 0x22b   :  { %v895_v59 = vpop.xlane.xlu0 %244 }
 0x22c   :  { %vm255_vm4 = vcmp.eq.f32.partialorder %v879_v48, %v895_v59 }
 0x22d   :  { %v259_v60 = vsel %vm255_vm4, %v876_v46, 16 }
 0x22e   :  { %v263_v61 = vsel %vm242_vm3, %v259_v60, 2147483647 }
 0x22f   :  { %v265_v62 = vshra.s32 %v263_v61, 16  ;;  %v264_v15 = vand.u32 65535, %v263_v61 }
 0x231   :  { %v267_v63 = vcvt.s32.f32 %v265_v62  ;;  %v266_v17 = vcvt.s32.f32 %v264_v15 }
 0x233   :  { %268 = vmin.xlane.f32.xlu2 %v267_v63  ;;  %v901_v0 = vpop.xlane.xlu0 %247 }
 0x234   :  { %vm256_vm5 = vcmp.eq.f32.partialorder %v883_v51, %v901_v0 }
 0x235   :  { %v260_v1 = vsel %vm256_vm5, %v876_v46, 16 }
 0x236   :  { %v278_v2 = vsel %vm242_vm3, %v260_v1, 2147483647 }
 0x237   :  { %v280_v3 = vshra.s32 %v278_v2, 16  ;;  %v279_v19 = vand.u32 65535, %v278_v2 }
 0x239   :  { %v282_v4 = vcvt.s32.f32 %v280_v3  ;;  %v281_v21 = vcvt.s32.f32 %v279_v19 }
 0x23b   :  { %283 = vmin.xlane.f32.xlu2 %v282_v4  ;;  %v907_v5 = vpop.xlane.xlu1 %250 }
 0x23c   :  { %vm257_vm6 = vcmp.eq.f32.partialorder %v887_v54, %v907_v5 }
 0x23d   :  { %v261_v6 = vsel %vm257_vm6, %v876_v46, 16 }
 0x23e   :  { %v293_v7 = vsel %vm242_vm3, %v261_v6, 2147483647 }
 0x23f   :  { %v295_v8 = vshra.s32 %v293_v7, 16  ;;  %v294_v23 = vand.u32 65535, %v293_v7 }
 0x241   :  { %v297_v9 = vcvt.s32.f32 %v295_v8  ;;  %v296_v25 = vcvt.s32.f32 %v294_v23 }
 0x243   :  { %298 = vmin.xlane.f32.xlu0 %v297_v9  ;;  %v913_v10 = vpop.xlane.xlu1 %253 }
 0x244   :  { %vm258_vm7 = vcmp.eq.f32.partialorder %v891_v57, %v913_v10 }
 0x245   :  { %v262_v11 = vsel %vm258_vm7, %v876_v46, 16 }
 0x246   :  { %v308_v12 = vsel %vm242_vm3, %v262_v11, 2147483647 }
 0x247   :  { %v310_v13 = vshra.s32 %v308_v12, 16  ;;  %v309_v27 = vand.u32 65535, %v308_v12 }
 0x249   :  { %v312_v14 = vcvt.s32.f32 %v310_v13  ;;  %v311_v29 = vcvt.s32.f32 %v309_v27 }
 0x24b   :  { %313 = vmin.xlane.f32.xlu1 %v312_v14 }
 0x2a6   :  { %v269_v16 = vpop.xlane.xlu2 %268 }
 0x2a7   :  { %vm270_vm8 = vcmp.eq.f32.partialorder %v267_v63, %v269_v16  ;;  %v275_v31 = vcvt.f32.s32 %v269_v16 }
 0x2a8   :  { %v271_v18 = vsel %vm270_vm8, %v266_v17, inf }
 0x2a9   :  { %272 = vmin.xlane.f32.xlu2 %v271_v18  ;;  %v276_v33 = vshll.u32 %v275_v31, 16 }
 0x2ae   :  { %v284_v20 = vpop.xlane.xlu2 %283 }
 0x2af   :  { %vm285_vm9 = vcmp.eq.f32.partialorder %v282_v4, %v284_v20  ;;  %v290_v36 = vcvt.f32.s32 %v284_v20 }
 0x2b0   :  { %v286_v22 = vsel %vm285_vm9, %v281_v21, inf }
 0x2b1   :  { %287 = vmin.xlane.f32.xlu0 %v286_v22  ;;  %v291_v40 = vshll.u32 %v290_v36, 16 }
 0x2b6   :  { %v299_v24 = vpop.xlane.xlu0 %298 }
 0x2b7   :  { %vm300_vm10 = vcmp.eq.f32.partialorder %v297_v9, %v299_v24  ;;  %v305_v43 = vcvt.f32.s32 %v299_v24 }
 0x2b8   :  { %v301_v26 = vsel %vm300_vm10, %v296_v25, inf }
 0x2b9   :  { %302 = vmin.xlane.f32.xlu1 %v301_v26 }
 0x2be   :  { %v314_v28 = vpop.xlane.xlu1 %313 }
 0x2bf   :  { %vm315_vm11 = vcmp.eq.f32.partialorder %v312_v14, %v314_v28  ;;  %v320_v52 = vcvt.f32.s32 %v314_v28 }
 0x2c0   :  { %v316_v30 = vsel %vm315_vm11, %v311_v29, inf }
 0x2c1   :  { %317 = vmin.xlane.f32.xlu2 %v316_v30  ;;  %v321_v56 = vshll.u32 %v320_v52, 16 }
 0x31c   :  { %v273_v32 = vpop.xlane.xlu2 %272 }
 0x31d   :  { %v274_v34 = vcvt.f32.s32 %v273_v32 }
 0x31f   :  { %v919_v35 = vadd.s32 %v276_v33, %v274_v34 }
 0x321   :  { %vm323_vm12 = vcmp.eq.s32.totalorder %v876_v46, %v919_v35 }
 0x322   :  { %v924_v37 = vsel %vm323_vm12, -inf, %v879_v48  ;;  %v306_v48 = vshll.u32 %v305_v43, 16 }
 0x323   :  { %v331_v38 = vsel %vm242_vm3, %v924_v37, -inf }
 0x324   :  { %332 = vmax.xlane.f32.xlu0 %v331_v38  ;;  %v288_v39 = vpop.xlane.xlu0 %287 }
 0x325   :  { %v289_v41 = vcvt.f32.s32 %v288_v39 }
 0x327   :  { %v928_v42 = vadd.s32 %v291_v40, %v289_v41 }
 0x329   :  { %vm324_vm13 = vcmp.eq.s32.totalorder %v876_v46, %v928_v42 }
 0x32a   :  { %v933_v44 = vsel %vm324_vm13, -inf, %v883_v51  ;;  %vm587_vm13 = vcmask 7168  }
 0x32b   :  { %v334_v45 = vsel %vm242_vm3, %v933_v44, -inf }
 0x32c   :  { %335 = vmax.xlane.f32.xlu1 %v334_v45  ;;  %v303_v47 = vpop.xlane.xlu1 %302 }
 0x32d   :  { %v304_v49 = vcvt.f32.s32 %v303_v47 }
 0x32f   :  { %v937_v50 = vadd.s32 %v306_v48, %v304_v49 }
 0x331   :  { %vm325_vm14 = vcmp.eq.s32.totalorder %v876_v46, %v937_v50 }
 0x332   :  { %v942_v53 = vsel %vm325_vm14, -inf, %v887_v54  ;;  %vm592_vm14 = vcmask 15360  }
 0x333   :  { %v337_v51 = vsel %vm242_vm3, %v942_v53, -inf }
 0x334   :  { %338 = vmax.xlane.f32.xlu2 %v337_v51  ;;  %v318_v55 = vpop.xlane.xlu2 %317 }
 0x335   :  { %v319_v58 = vcvt.f32.s32 %v318_v55 }
 0x337   :  { %v946_v60 = vadd.s32 %v321_v56, %v319_v58 }
 0x339   :  { %vm326_vm15 = vcmp.eq.s32.totalorder %v876_v46, %v946_v60 }
 0x33a   :  { %v951_v61 = vsel %vm326_vm15, -inf, %v891_v57 }
 0x33b   :  { %v340_v62 = vsel %vm242_vm3, %v951_v61, -inf }
 0x33c   :  { %341 = vmax.xlane.f32.xlu0 %v340_v62 }
 0x397   :  { %v955_v54 = vpop.xlane.xlu0 %332 }
 0x398   :  { %vm343_vm0 = vcmp.eq.f32.partialorder %v924_v37, %v955_v54 }
 0x399   :  { %v347_v63 = vsel %vm343_vm0, %v876_v46, 16 }
 0x39a   :  { %v351_v1 = vsel %vm242_vm3, %v347_v63, 2147483647 }
 0x39b   :  { %v353_v2 = vshra.s32 %v351_v1, 16  ;;  %v352_v20 = vand.u32 65535, %v351_v1 }
 0x39d   :  { %v355_v3 = vcvt.s32.f32 %v353_v2  ;;  %v354_v22 = vcvt.s32.f32 %v352_v20 }
 0x39f   :  { %356 = vmin.xlane.f32.xlu1 %v355_v3  ;;  %v961_v4 = vpop.xlane.xlu1 %335 }
 0x3a0   :  { %vm344_vm1 = vcmp.eq.f32.partialorder %v933_v44, %v961_v4 }
 0x3a1   :  { %v348_v57 = vsel %vm344_vm1, %v876_v46, 16 }
 0x3a2   :  { %v366_v6 = vsel %vm242_vm3, %v348_v57, 2147483647 }
 0x3a3   :  { %v368_v7 = vshra.s32 %v366_v6, 16  ;;  %v367_v24 = vand.u32 65535, %v366_v6 }
 0x3a5   :  { %v370_v8 = vcvt.s32.f32 %v368_v7  ;;  %v369_v26 = vcvt.s32.f32 %v367_v24 }
 0x3a7   :  { %371 = vmin.xlane.f32.xlu2 %v370_v8  ;;  %v967_v9 = vpop.xlane.xlu2 %338 }
 0x3a8   :  { %vm345_vm2 = vcmp.eq.f32.partialorder %v942_v53, %v967_v9 }
 0x3a9   :  { %v349_v11 = vsel %vm345_vm2, %v876_v46, 16 }
 0x3aa   :  { %v381_v12 = vsel %vm242_vm3, %v349_v11, 2147483647 }
 0x3ab   :  { %v383_v13 = vshra.s32 %v381_v12, 16  ;;  %v382_v28 = vand.u32 65535, %v381_v12 }
 0x3ad   :  { %v385_v14 = vcvt.s32.f32 %v383_v13  ;;  %v384_v30 = vcvt.s32.f32 %v382_v28 }
 0x3af   :  { %v973_v15 = vpop.xlane.xlu0 %341  ;;  %386 = vmin.xlane.f32.xlu0 %v385_v14 }
 0x3b0   :  { %vm346_vm4 = vcmp.eq.f32.partialorder %v951_v61, %v973_v15 }
 0x3b1   :  { %v350_v16 = vsel %vm346_vm4, %v876_v46, 16 }
 0x3b2   :  { %v396_v17 = vsel %vm242_vm3, %v350_v16, 2147483647 }
 0x3b3   :  { %v398_v18 = vshra.s32 %v396_v17, 16  ;;  %v397_v32 = vand.u32 65535, %v396_v17 }
 0x3b5   :  { %v400_v19 = vcvt.s32.f32 %v398_v18  ;;  %v399_v34 = vcvt.s32.f32 %v397_v32 }
 0x3b7   :  { %401 = vmin.xlane.f32.xlu1 %v400_v19 }
 0x412   :  { %v357_v21 = vpop.xlane.xlu1 %356 }
 0x413   :  { %vm358_vm5 = vcmp.eq.f32.partialorder %v355_v3, %v357_v21  ;;  %v363_v38 = vcvt.f32.s32 %v357_v21 }
 0x414   :  { %v359_v23 = vsel %vm358_vm5, %v354_v22, inf }
 0x415   :  { %360 = vmin.xlane.f32.xlu2 %v359_v23  ;;  %v364_v40 = vshll.u32 %v363_v38, 16 }
 0x41a   :  { %v372_v25 = vpop.xlane.xlu2 %371 }
 0x41b   :  { %vm373_vm6 = vcmp.eq.f32.partialorder %v370_v8, %v372_v25  ;;  %v378_v45 = vcvt.f32.s32 %v372_v25 }
 0x41c   :  { %v374_v27 = vsel %vm373_vm6, %v369_v26, inf }
 0x41d   :  { %375 = vmin.xlane.f32.xlu0 %v374_v27  ;;  %v379_v52 = vshll.u32 %v378_v45, 16 }
 0x422   :  { %v387_v29 = vpop.xlane.xlu0 %386 }
 0x423   :  { %vm388_vm7 = vcmp.eq.f32.partialorder %v385_v14, %v387_v29  ;;  %v393_v56 = vcvt.f32.s32 %v387_v29 }
 0x424   :  { %v389_v31 = vsel %vm388_vm7, %v384_v30, inf }
 0x425   :  { %390 = vmin.xlane.f32.xlu1 %v389_v31  ;;  %v394_v63 = vshll.u32 %v393_v56, 16 }
 0x42a   :  { %v402_v33 = vpop.xlane.xlu1 %401 }
 0x42b   :  { %vm403_vm8 = vcmp.eq.f32.partialorder %v400_v19, %v402_v33  ;;  %v408_v3 = vcvt.f32.s32 %v402_v33 }
 0x42c   :  { %v404_v36 = vsel %vm403_vm8, %v399_v34, inf }
 0x42d   :  { %405 = vmin.xlane.f32.xlu2 %v404_v36  ;;  %v409_v7 = vshll.u32 %v408_v3, 16 }
 0x488   :  { %v361_v39 = vpop.xlane.xlu2 %360 }
 0x489   :  { %v362_v41 = vcvt.f32.s32 %v361_v39 }
 0x48b   :  { %v979_v43 = vadd.s32 %v364_v40, %v362_v41 }
 0x48d   :  { %vm411_vm9 = vcmp.eq.s32.totalorder %v876_v46, %v979_v43 }
 0x48e   :  { %v984_v47 = vsel %vm411_vm9, -inf, %v924_v37 }
 0x48f   :  { %v419_v48 = vsel %vm242_vm3, %v984_v47, -inf }
 0x490   :  { %v376_v49 = vpop.xlane.xlu0 %375  ;;  %420 = vmax.xlane.f32.xlu0 %v419_v48 }
 0x491   :  { %v377_v51 = vcvt.f32.s32 %v376_v49 }
 0x493   :  { %v988_v55 = vadd.s32 %v379_v52, %v377_v51 }
 0x495   :  { %vm412_vm10 = vcmp.eq.s32.totalorder %v876_v46, %v988_v55 }
 0x496   :  { %v993_v58 = vsel %vm412_vm10, -inf, %v933_v44 }
 0x497   :  { %v422_v37 = vsel %vm242_vm3, %v993_v58, -inf }
 0x498   :  { %v391_v62 = vpop.xlane.xlu1 %390  ;;  %423 = vmax.xlane.f32.xlu1 %v422_v37 }
 0x499   :  { %v392_v1 = vcvt.f32.s32 %v391_v62 }
 0x49b   :  { %v997_v2 = vadd.s32 %v394_v63, %v392_v1 }
 0x49d   :  { %vm413_vm11 = vcmp.eq.s32.totalorder %v876_v46, %v997_v2 }
 0x49e   :  { %v1002_v57 = vsel %vm413_vm11, -inf, %v942_v53  ;;  %v588_v53 = vsel %vm587_vm13, %v895_v59, %v955_v54 }
 0x49f   :  { %v425_v44 = vsel %vm242_vm3, %v1002_v57, -inf }
 0x4a0   :  { %426 = vmax.xlane.f32.xlu2 %v425_v44  ;;  %v406_v6 = vpop.xlane.xlu2 %405 }
 0x4a1   :  { %v407_v8 = vcvt.f32.s32 %v406_v6 }
 0x4a3   :  { %v1006_v11 = vadd.s32 %v409_v7, %v407_v8  ;;  %v602_v8 = vsel %vm587_vm13, %v919_v35, %v979_v43 }
 0x4a5   :  { %vm414_vm12 = vcmp.eq.s32.totalorder %v876_v46, %v1006_v11 }
 0x4a6   :  { %v1011_v12 = vsel %vm414_vm12, -inf, %v951_v61  ;;  %vm597_vm12 = vcmask 23552  }
 0x4a7   :  { %v428_v13 = vsel %vm242_vm3, %v1011_v12, -inf }
 0x4a8   :  { %429 = vmax.xlane.f32.xlu0 %v428_v13 }
 0x503   :  { %v421_v14 = vpop.xlane.xlu0 %420 }
 0x504   :  { %vm431_vm15 = vcmp.eq.f32.partialorder %v984_v47, %v421_v14  ;;  %v1020_v16 = vsel %vm592_vm14, %v588_v53, %v421_v14 }
 0x505   :  { %v435_v17 = vsel %vm431_vm15, %v876_v46, 16  ;;  %vm614_vm15 = vcmask 31744  }
 0x506   :  { %v439_v61 = vsel %vm242_vm3, %v435_v17, 2147483647 }
 0x507   :  { %v441_v18 = vshra.s32 %v439_v61, 16  ;;  %v440_v33 = vand.u32 65535, %v439_v61 }
 0x509   :  { %v443_v19 = vcvt.s32.f32 %v441_v18  ;;  %v442_v36 = vcvt.s32.f32 %v440_v33 }
 0x50b   :  { %v1024_v20 = vpop.xlane.xlu1 %423  ;;  %444 = vmin.xlane.f32.xlu1 %v443_v19 }
 0x50c   :  { %vm432_vm0 = vcmp.eq.f32.partialorder %v993_v58, %v1024_v20 }
 0x50d   :  { %v436_v59 = vsel %vm432_vm0, %v876_v46, 16 }
 0x50e   :  { %v454_v54 = vsel %vm242_vm3, %v436_v59, 2147483647 }
 0x50f   :  { %v456_v21 = vshra.s32 %v454_v54, 16  ;;  %v455_v39 = vand.u32 65535, %v454_v54  ;;  %v603_v54 = vsel %vm587_vm13, %v928_v42, %v988_v55 }
 0x511   :  { %v458_v22 = vcvt.s32.f32 %v456_v21  ;;  %v457_v41 = vcvt.s32.f32 %v455_v39 }
 0x513   :  { %459 = vmin.xlane.f32.xlu2 %v458_v22  ;;  %v1030_v23 = vpop.xlane.xlu2 %426 }
 0x514   :  { %vm433_vm1 = vcmp.eq.f32.partialorder %v1002_v57, %v1030_v23 }
 0x515   :  { %v437_v24 = vsel %vm433_vm1, %v876_v46, 16 }
 0x516   :  { %v469_v25 = vsel %vm242_vm3, %v437_v24, 2147483647 }
 0x517   :  { %v471_v26 = vshra.s32 %v469_v25, 16  ;;  %v470_v48 = vand.u32 65535, %v469_v25 }
 0x519   :  { %v473_v27 = vcvt.s32.f32 %v471_v26  ;;  %v472_v52 = vcvt.s32.f32 %v470_v48 }
 0x51b   :  { %v1036_v28 = vpop.xlane.xlu0 %429  ;;  %474 = vmin.xlane.f32.xlu0 %v473_v27 }
 0x51c   :  { %vm434_vm2 = vcmp.eq.f32.partialorder %v1011_v12, %v1036_v28 }
 0x51d   :  { %v438_v29 = vsel %vm434_vm2, %v876_v46, 16 }
 0x51e   :  { %v484_v30 = vsel %vm242_vm3, %v438_v29, 2147483647 }
 0x51f   :  { %v486_v31 = vshra.s32 %v484_v30, 16  ;;  %v485_v56 = vand.u32 65535, %v484_v30 }
 0x521   :  { %v488_v32 = vcvt.s32.f32 %v486_v31  ;;  %v487_v62 = vcvt.s32.f32 %v485_v56 }
 0x523   :  { %489 = vmin.xlane.f32.xlu1 %v488_v32 }
 0x57e   :  { %v445_v34 = vpop.xlane.xlu1 %444 }
 0x57f   :  { %vm446_vm4 = vcmp.eq.f32.partialorder %v443_v19, %v445_v34  ;;  %v451_v1 = vcvt.f32.s32 %v445_v34  ;;  %v605_v34 = vsel %vm587_vm13, %v946_v60, %v1006_v11  ;;  %v589_v60 = vsel %vm587_vm13, %v901_v0, %v961_v4 }
 0x580   :  { %v447_v38 = vsel %vm446_vm4, %v442_v36, inf }
 0x581   :  { %448 = vmin.xlane.f32.xlu2 %v447_v38  ;;  %v452_v44 = vshll.u32 %v451_v1, 16 }
 0x586   :  { %v460_v40 = vpop.xlane.xlu2 %459 }
 0x587   :  { %vm461_vm5 = vcmp.eq.f32.partialorder %v458_v22, %v460_v40  ;;  %v466_v13 = vcvt.f32.s32 %v460_v40 }
 0x588   :  { %v462_v45 = vsel %vm461_vm5, %v457_v41, inf }
 0x589   :  { %463 = vmin.xlane.f32.xlu0 %v462_v45  ;;  %v467_v18 = vshll.u32 %v466_v13, 16 }
 0x58e   :  { %v475_v49 = vpop.xlane.xlu0 %474 }
 0x58f   :  { %vm476_vm6 = vcmp.eq.f32.partialorder %v473_v27, %v475_v49  ;;  %v481_v35 = vcvt.f32.s32 %v475_v49  ;;  %v604_v27 = vsel %vm587_vm13, %v937_v50, %v997_v2  ;;  %v590_v49 = vsel %vm587_vm13, %v907_v5, %v967_v9 }
 0x590   :  { %v477_v51 = vsel %vm476_vm6, %v472_v52, inf  ;;  %v595_v4 = vsel %vm592_vm14, %v590_v49, %v1030_v23  ;;  %v591_v5 = vsel %vm587_vm13, %v913_v10, %v973_v15 }
 0x591   :  { %478 = vmin.xlane.f32.xlu1 %v477_v51  ;;  %v482_v24 = vshll.u32 %v481_v35, 16  ;;  %v596_v23 = vsel %vm592_vm14, %v591_v5, %v1036_v28 }
 0x596   :  { %v490_v37 = vpop.xlane.xlu1 %489 }
 0x597   :  { %vm491_vm7 = vcmp.eq.f32.partialorder %v488_v32, %v490_v37  ;;  %v496_v42 = vcvt.f32.s32 %v490_v37 }
 0x598   :  { %v492_v63 = vsel %vm491_vm7, %v487_v62, inf }
 0x599   :  { %493 = vmin.xlane.f32.xlu2 %v492_v63  ;;  %v497_v31 = vshll.u32 %v496_v42, 16 }
 0x5f4   :  { %v449_v3 = vpop.xlane.xlu2 %448 }
 0x5f5   :  { %v450_v6 = vcvt.f32.s32 %v449_v3 }
 0x5f7   :  { %v453_v7 = vadd.s32 %v452_v44, %v450_v6 }
 0x5f9   :  { %v1046_v53 = vsel %vm592_vm14, %v602_v8, %v453_v7  ;;  %vm499_vm8 = vcmp.eq.s32.totalorder %v876_v46, %v453_v7 }
 0x5fa   :  { %v503_v14 = vsel %vm499_vm8, -inf, %v984_v47 }
 0x5fb   :  { %v507_v17 = vsel %vm242_vm3, %v503_v14, -inf }
 0x5fc   :  { %v464_v61 = vpop.xlane.xlu0 %463  ;;  %508 = vmax.xlane.f32.xlu0 %v507_v17 }
 0x5fd   :  { %v465_v19 = vcvt.f32.s32 %v464_v61 }
 0x5ff   :  { %v468_v59 = vadd.s32 %v467_v18, %v465_v19 }
 0x601   :  { %v1055_v43 = vsel %vm592_vm14, %v603_v54, %v468_v59  ;;  %vm500_vm9 = vcmp.eq.s32.totalorder %v876_v46, %v468_v59 }
 0x602   :  { %v504_v21 = vsel %vm500_vm9, -inf, %v993_v58 }
 0x603   :  { %v510_v47 = vsel %vm242_vm3, %v504_v21, -inf }
 0x604   :  { %v479_v22 = vpop.xlane.xlu1 %478  ;;  %511 = vmax.xlane.f32.xlu1 %v510_v47 }
 0x605   :  { %v480_v25 = vcvt.f32.s32 %v479_v22 }
 0x607   :  { %v483_v26 = vadd.s32 %v482_v24, %v480_v25 }
 0x609   :  { %v1064_v55 = vsel %vm592_vm14, %v604_v27, %v483_v26  ;;  %vm501_vm10 = vcmp.eq.s32.totalorder %v876_v46, %v483_v26 }
 0x60a   :  { %v505_v29 = vsel %vm501_vm10, -inf, %v1002_v57 }
 0x60b   :  { %v513_v58 = vsel %vm242_vm3, %v505_v29, -inf }
 0x60c   :  { %514 = vmax.xlane.f32.xlu2 %v513_v58  ;;  %v494_v30 = vpop.xlane.xlu2 %493 }
 0x60d   :  { %v495_v32 = vcvt.f32.s32 %v494_v30 }
 0x60f   :  { %v498_v33 = vadd.s32 %v497_v31, %v495_v32 }
 0x611   :  { %v1073_v50 = vsel %vm592_vm14, %v605_v34, %v498_v33  ;;  %vm502_vm11 = vcmp.eq.s32.totalorder %v876_v46, %v498_v33 }
 0x612   :  { %v506_v2 = vsel %vm502_vm11, -inf, %v1011_v12  ;;  %v594_v12 = vsel %vm592_vm14, %v589_v60, %v1024_v20 }
 0x613   :  { %v516_v57 = vsel %vm242_vm3, %v506_v2, -inf }
 0x614   :  { %517 = vmax.xlane.f32.xlu0 %v516_v57 }
 0x66f   :  { %v509_v36 = vpop.xlane.xlu0 %508 }
 0x670   :  { %v598_v38 = vsel %vm597_vm12, %v1020_v16, %v509_v36  ;;  %vm519_vm0 = vcmp.eq.f32.partialorder %v503_v14, %v509_v36 }
 0x671   :  { %v615_v39 = vsel %vm614_vm15, %v598_v38, -inf  ;;  %v523_v11 = vsel %vm519_vm0, %v876_v46, 16 }
 0x672   :  { %616 = vmax.xlane.f32.xlu1 %v615_v39  ;;  %v527_v16 = vsel %vm242_vm3, %v523_v11, 2147483647 }
 0x673   :  { %v529_v48 = vshra.s32 %v527_v16, 16  ;;  %v528_v26 = vand.u32 65535, %v527_v16 }
 0x675   :  { %v531_v52 = vcvt.s32.f32 %v529_v48 }
 0x677   :  { %v512_v40 = vpop.xlane.xlu1 %511 }
 0x678   :  { %v599_v41 = vsel %vm597_vm12, %v594_v12, %v512_v40  ;;  %vm520_vm1 = vcmp.eq.f32.partialorder %v504_v21, %v512_v40 }
 0x679   :  { %v618_v45 = vsel %vm614_vm15, %v599_v41, -inf  ;;  %v524_v0 = vsel %vm520_vm1, %v876_v46, 16 }
 0x67a   :  { %619 = vmax.xlane.f32.xlu2 %v618_v45  ;;  %v542_v37 = vsel %vm242_vm3, %v524_v0, 2147483647 }
 0x67b   :  { %v544_v62 = vshra.s32 %v542_v37, 16  ;;  %v543_v34 = vand.u32 65535, %v542_v37 }
 0x67d   :  { %v546_v3 = vcvt.s32.f32 %v544_v62  ;;  %v545_v36 = vcvt.s32.f32 %v543_v34 }
 0x67f   :  { %v515_v20 = vpop.xlane.xlu2 %514 }
 0x680   :  { %v600_v51 = vsel %vm597_vm12, %v595_v4, %v515_v20  ;;  %vm521_vm2 = vcmp.eq.f32.partialorder %v505_v29, %v515_v20  ;;  %v530_v29 = vcvt.s32.f32 %v528_v26 }
 0x681   :  { %v621_v56 = vsel %vm614_vm15, %v600_v51, -inf  ;;  %v525_v9 = vsel %vm521_vm2, %v876_v46, 16 }
 0x682   :  { %532 = vmin.xlane.f32.xlu2 %v531_v52  ;;  %622 = vmax.xlane.f32.xlu0 %v621_v56  ;;  %v557_v7 = vsel %vm242_vm3, %v525_v9, 2147483647 }
 0x683   :  { %v559_v8 = vshra.s32 %v557_v7, 16 }
 0x685   :  { %v561_v28 = vcvt.s32.f32 %v559_v8 }
 0x687   :  { %v518_v63 = vpop.xlane.xlu0 %517 }
 0x688   :  { %vm522_vm4 = vcmp.eq.f32.partialorder %v506_v2, %v518_v63  ;;  %v601_v1 = vsel %vm597_vm12, %v596_v23, %v518_v63 }
 0x689   :  { %v526_v44 = vsel %vm522_vm4, %v876_v46, 16  ;;  %v624_v6 = vsel %vm614_vm15, %v601_v1, -inf }
 0x68a   :  { %625 = vmax.xlane.f32.xlu1 %v624_v6  ;;  %547 = vmin.xlane.f32.xlu0 %v546_v3  ;;  %v572_v10 = vsel %vm242_vm3, %v526_v44, 2147483647 }
 0x68b   :  { %v574_v15 = vshra.s32 %v572_v10, 16  ;;  %v573_v57 = vand.u32 65535, %v572_v10 }
 0x68d   :  { %v576_v13 = vcvt.s32.f32 %v574_v15  ;;  %v575_v39 = vcvt.s32.f32 %v573_v57 }
 0x68f   :  { %577 = vmin.xlane.f32.xlu2 %v576_v13 }
 0x692   :  { %562 = vmin.xlane.f32.xlu1 %v561_v28 }
 0x6e5   :  { %v617_v14 = vpop.xlane.xlu1 %616 }
 0x6e6   :  { %v627_v17 = vsub.f32 %v598_v38, %v617_v14 }
 0x6e8   :  { %v631_v61 = vmul.f32 1.442695, %v627_v17 }
 0x6ea   :  { %782 = vpow2.f32 %v631_v61 }
 0x6ed   :  { %v620_v18 = vpop.xlane.xlu2 %619 }
 0x6ee   :  { %v628_v46 = vsub.f32 %v599_v41, %v620_v18  ;;  %v558_v41 = vand.u32 65535, %v557_v7 }
 0x6f0   :  { %v1110_v19 = vpop.eup %782  ;;  %v633_v59 = vmul.f32 1.442695, %v628_v46  ;;  %v560_v45 = vcvt.s32.f32 %v558_v41 }
 0x6f1   :  { %v639_v54 = vsel %vm614_vm15, %v1110_v19, 0.0 }
 0x6f2   :  { %784 = vpow2.f32 %v633_v59  ;;  %640 = vadd.xlane.f32.xlu0 %v639_v54 }
 0x6f5   :  { %v623_v35 = vpop.xlane.xlu0 %622  ;;  %v533_v25 = vpop.xlane.xlu2 %532 }
 0x6f6   :  { %v629_v21 = vsub.f32 %v600_v51, %v623_v35  ;;  %vm534_vm3 = vcmp.eq.f32.partialorder %v531_v52, %v533_v25  ;;  %v539_v37 = vcvt.f32.s32 %v533_v25 }
 0x6f7   :  { %v535_v32 = vsel %vm534_vm3, %v530_v29, inf }
 0x6f8   :  { %v1114_v47 = vpop.eup %784  ;;  %v635_v22 = vmul.f32 1.442695, %v629_v21  ;;  %v540_v44 = vshll.u32 %v539_v37, 16 }
 0x6f9   :  { %v642_v24 = vsel %vm614_vm15, %v1114_v47, 0.0 }
 0x6fa   :  { %786 = vpow2.f32 %v635_v22  ;;  %643 = vadd.xlane.f32.xlu1 %v642_v24 }
 0x6fd   :  { %v626_v27 = vpop.xlane.xlu1 %625  ;;  %v1122_v33 = vpop.xlane.xlu0 %547 }
 0x6fe   :  { %v630_v42 = vsub.f32 %v601_v1, %v626_v27  ;;  %vm549_vm13 = vcmp.eq.f32.partialorder %v546_v3, %v1122_v33 }
 0x6ff   :  { %v550_v11 = vsel %vm549_vm13, %v545_v36, inf }
 0x700   :  { %v1118_v58 = vpop.eup %786  ;;  %v637_v30 = vmul.f32 1.442695, %v630_v42 }
 0x701   :  { %v645_v31 = vsel %vm614_vm15, %v1118_v58, 0.0 }
 0x702   :  { %788 = vpow2.f32 %v637_v30  ;;  %646 = vadd.xlane.f32.xlu2 %v645_v31  ;;  %536 = vmin.xlane.f32.xlu1 %v535_v32  ;;  %v1124_v2 = vpop.xlane.xlu2 %577 }
 0x703   :  { %vm579_vm14 = vcmp.eq.f32.partialorder %v576_v13, %v1124_v2  ;;  %v584_v61 = vcvt.f32.s32 %v1124_v2 }
 0x704   :  { %v580_v12 = vsel %vm579_vm14, %v575_v39, inf }
 0x705   :  { %v1132_v40 = vpop.xlane.xlu1 %562  ;;  %v585_v25 = vshll.u32 %v584_v61, 16 }
 0x706   :  { %vm564_vm5 = vcmp.eq.f32.partialorder %v561_v28, %v1132_v40  ;;  %v569_v2 = vcvt.f32.s32 %v1132_v40 }
 0x707   :  { %v565_v16 = vsel %vm564_vm5, %v560_v45, inf }
 0x708   :  { %v1128_v38 = vpop.eup %788  ;;  %v570_v41 = vshll.u32 %v569_v2, 16 }
 0x709   :  { %v648_v60 = vsel %vm614_vm15, %v1128_v38, 0.0 }
 0x70a   :  { %649 = vadd.xlane.f32.xlu0 %v648_v60  ;;  %551 = vmin.xlane.f32.xlu2 %v550_v11 }
 0x70b   :  { %581 = vmin.xlane.f32.xlu1 %v580_v12 }
 0x712   :  { %566 = vmin.xlane.f32.xlu0 %v565_v16 }
 0x765   :  { %v641_v48 = vpop.xlane.xlu0 %640 }
 0x766   :  { %790 = vrcp.f32 %v641_v48  ;;  %v662_v52 = vand.u32 2147483648, %v641_v48  ;;  %v660_v56 = vand.u32 2147483647, %v641_v48  ;;  %vm656_vm7 = vweird.f32 %v641_v48 }
 0x768   :  { %v663_v9 = vor.u32 1.1754944e-38, %v662_v52  ;;  %vm661_vm9 = vcmp.eq.f32.partialorder %v660_v56, 8.507059e+37 }
 0x76c   :  { %v791_v49 = vpop.eup %790 }
 0x76d   :  { %v652_v0 = vmul.f32 %v791_v49, %v641_v48  ;;  %v644_v4 = vpop.xlane.xlu1 %643  ;;  %vm657_vm6 = vweird.f32 %v791_v49 }
 0x76e   :  { %792 = vrcp.f32 %v644_v4  ;;  %vm658_vm8 = vmor %vm656_vm7, %vm657_vm6  ;;  %v677_v8 = vand.u32 2147483648, %v644_v4  ;;  %v675_v14 = vand.u32 2147483647, %v644_v4  ;;  %vm671_vm11 = vweird.f32 %v644_v4 }
 0x76f   :  { %v653_v20 = vsub.f32 1.0, %v652_v0 }
 0x770   :  { %v678_v59 = vor.u32 1.1754944e-38, %v677_v8  ;;  %vm676_vm1 = vcmp.eq.f32.partialorder %v675_v14, 8.507059e+37 }
 0x771   :  { %v654_v51 = vmul.f32 %v791_v49, %v653_v20 }
 0x773   :  { %v655_v62 = vadd.f32 %v791_v49, %v654_v51 }
 0x774   :  { %v793_v5 = vpop.eup %792 }
 0x775   :  { %v659_v23 = vsel %vm658_vm8, %v791_v49, %v655_v62  ;;  %v667_v63 = vmul.f32 %v793_v5, %v644_v4  ;;  %v537_v1 = vpop.xlane.xlu1 %536  ;;  %v647_v3 = vpop.xlane.xlu2 %646  ;;  %vm672_vm10 = vweird.f32 %v793_v5 }
 0x776   :  { %v664_v6 = vsel %vm661_vm9, %v663_v9, %v659_v23  ;;  %v538_v7 = vcvt.f32.s32 %v537_v1  ;;  %794 = vrcp.f32 %v647_v3  ;;  %vm673_vm0 = vmor %vm671_vm11, %vm672_vm10  ;;  %v692_v30 = vand.u32 2147483648, %v647_v3 }
 0x777   :  { %v665_v10 = vmul.f32 %v1110_v19, %v664_v6  ;;  %v668_v15 = vsub.f32 1.0, %v667_v63  ;;  %v554_v19 = vcvt.f32.s32 %v1122_v33  ;;  %v690_v33 = vand.u32 2147483647, %v647_v3 }
 0x778   :  { %v541_v13 = vadd.s32 %v540_v44, %v538_v7  ;;  %vm686_vm4 = vweird.f32 %v647_v3  ;;  %v693_v60 = vor.u32 1.1754944e-38, %v692_v30 }
 0x779   :  { %711 = vst.msk [vmem:[%s1187_s5] sm:$0xff] %vm614_vm15, %v665_v10  ;;  %v669_v28 = vmul.f32 %v793_v5, %v668_v15  ;;  %v555_v29 = vshll.u32 %v554_v19, 16  ;;  %vm691_vm13 = vcmp.eq.f32.partialorder %v690_v33, 8.507059e+37 }
 0x77a   :  { %v610_v17 = vsel %vm597_vm12, %v1046_v53, %v541_v13 }
 0x77b   :  { %v670_v18 = vadd.f32 %v793_v5, %v669_v28  ;;  %715 = vst.msk [vmem:[%s1188_s6] sm:$0xff] %vm614_vm15, %v610_v17 }
 0x77c   :  { %v795_v46 = vpop.eup %794 }
 0x77d   :  { %v674_v54 = vsel %vm673_vm0, %v793_v5, %v670_v18  ;;  %v682_v35 = vmul.f32 %v795_v46, %v647_v3  ;;  %v650_v21 = vpop.xlane.xlu0 %649  ;;  %v552_v22 = vpop.xlane.xlu2 %551  ;;  %vm687_vm2 = vweird.f32 %v795_v46 }
 0x77e   :  { %v679_v53 = vsel %vm676_vm1, %v678_v59, %v674_v54  ;;  %796 = vrcp.f32 %v650_v21  ;;  %v582_v24 = vpop.xlane.xlu1 %581  ;;  %v553_v31 = vcvt.f32.s32 %v552_v22  ;;  %vm688_vm3 = vmor %vm686_vm4, %vm687_vm2  ;;  %v707_v0 = vand.u32 2147483648, %v650_v21 }
 0x77f   :  { %v680_v26 = vmul.f32 %v1114_v47, %v679_v53  ;;  %v683_v27 = vsub.f32 1.0, %v682_v35  ;;  %v583_v42 = vcvt.f32.s32 %v582_v24  ;;  %v705_v20 = vand.u32 2147483647, %v650_v21 }
 0x780   :  { %v556_v57 = vadd.s32 %v555_v29, %v553_v31  ;;  %vm701_vm5 = vweird.f32 %v650_v21 }
 0x781   :  { %712 = vst.msk [vmem:[%s1187_s5 + $0x8] sm:$0xff] %vm614_vm15, %v680_v26  ;;  %v684_v32 = vmul.f32 %v795_v46, %v683_v27  ;;  %v586_v34 = vadd.s32 %v585_v25, %v583_v42  ;;  %vm706_vm7 = vcmp.eq.f32.partialorder %v705_v20, 8.507059e+37 }
 0x782   :  { %v611_v11 = vsel %vm597_vm12, %v1055_v43, %v556_v57 }
 0x783   :  { %v685_v36 = vadd.f32 %v795_v46, %v684_v32  ;;  %v613_v47 = vsel %vm597_vm12, %v1073_v50, %v586_v34  ;;  %716 = vst.msk [vmem:[%s1188_s6 + $0x8] sm:$0xff] %vm614_vm15, %v611_v11 }
 0x784   :  { %v797_v39 = vpop.eup %796  ;;  %718 = vst.msk [vmem:[%s1188_s6 + $0x18] sm:$0xff] %vm614_vm15, %v613_v47 }
 0x785   :  { %v689_v12 = vsel %vm688_vm3, %v795_v46, %v685_v36  ;;  %v697_v40 = vmul.f32 %v797_v39, %v650_v21  ;;  %v567_v50 = vpop.xlane.xlu0 %566  ;;  %vm702_vm14 = vweird.f32 %v797_v39 }
 0x786   :  { %v694_v45 = vsel %vm691_vm13, %v693_v60, %v689_v12  ;;  %v568_v16 = vcvt.f32.s32 %v567_v50  ;;  %vm703_vm6 = vmor %vm701_vm5, %vm702_vm14 }
 0x787   :  { %v695_v48 = vmul.f32 %v1118_v58, %v694_v45  ;;  %v698_v49 = vsub.f32 1.0, %v697_v40  ;;  %v708_v58 = vor.u32 1.1754944e-38, %v707_v0 }
 0x788   :  { %v571_v4 = vadd.s32 %v570_v41, %v568_v16 }
 0x789   :  { %713 = vst.msk [vmem:[%s1187_s5 + $0x10] sm:$0xff] %vm614_vm15, %v695_v48  ;;  %v699_v43 = vmul.f32 %v797_v39, %v698_v49 }
 0x78a   :  { %v612_v52 = vsel %vm597_vm12, %v1064_v55, %v571_v4 }
 0x78b   :  { %v700_v51 = vadd.f32 %v797_v39, %v699_v43  ;;  %717 = vst.msk [vmem:[%s1188_s6 + $0x10] sm:$0xff] %vm614_vm15, %v612_v52 }
 0x78d   :  { %v704_v56 = vsel %vm703_vm6, %v797_v39, %v700_v51 }
 0x78e   :  { %v709_v37 = vsel %vm706_vm7, %v708_v58, %v704_v56 }
 0x78f   :  { %v710_v62 = vmul.f32 %v1128_v38, %v709_v37 }
 0x791   :  { %714 = vst.msk [vmem:[%s1187_s5 + $0x18] sm:$0xff] %vm614_vm15, %v710_v62 }

</bundles_post_ra>
